<compile_context>
chip_gen: v7x
topology: tpu7x:2x2x1
jax: 0.10.0
libtpu: 0.0.40
codegen_flags: <defaults>
</compile_context>

<pallas_src>
import jax
import jax.numpy as jnp
from jax import lax
from jax.experimental import pallas as pl
from jax.experimental.pallas import tpu as pltpu

# ---- small, module-consistent config (scaled-down Block) -----------------
N_EMBED   = 128                     # module uses 384; kept lane-dense (mult of 128)
NUM_HEADS = 4                       # module uses 6; n_embed % n_head == 0 holds
HEAD_SIZE = N_EMBED // NUM_HEADS    # 32
FFN_DIM   = 4 * N_EMBED             # 512
BATCH     = 2
SEQ       = 16                      # T <= block_size
SCALE     = N_EMBED ** (-0.5)       # wei = q@k^T * C**-0.5  (C = n_embed, as in source)
EPS       = 1e-5                    # PyTorch LayerNorm default
NEG_INF   = -1e30                   # finite mask value (avoids inf-inf = NaN)

# packed-parameter row indices (params8 is (8, C), rows 6/7 are padding)
_ROW_G1, _ROW_B1, _ROW_BP, _ROW_G2, _ROW_B2, _ROW_BF2 = 0, 1, 2, 3, 4, 5


# -------------------- fused Block kernel (one batch element) --------------
def _block_kernel(x_ref, prm_ref, wqkv_ref, wp_ref, w1_ref, b1_ref, w2_ref,
                  o_ref):
    # x_ref : (1, T, C) f32      prm_ref : (8, C) f32 (packed small params)
    # wqkv_ref: (C, 3C) bf16 (Q cols pre-scaled)   wp_ref: (C, C) bf16
    # w1_ref : (C, 4C) bf16      b1_ref : (1, 4C) f32   w2_ref: (4C, C) bf16
    x = x_ref[0]                                   # (T, C) f32
    T = x.shape[0]
    C = x.shape[1]

    g1  = prm_ref[_ROW_G1:_ROW_G1 + 1, :]
    bt1 = prm_ref[_ROW_B1:_ROW_B1 + 1, :]
    bp  = prm_ref[_ROW_BP:_ROW_BP + 1, :]
    g2  = prm_ref[_ROW_G2:_ROW_G2 + 1, :]
    bt2 = prm_ref[_ROW_B2:_ROW_B2 + 1, :]
    bf2 = prm_ref[_ROW_BF2:_ROW_BF2 + 1, :]

    def layer_norm(v, g, b):
        mu = jnp.mean(v, axis=-1, keepdims=True)
        d = v - mu
        var = jnp.mean(d * d, axis=-1, keepdims=True)
        return d * lax.rsqrt(var + EPS) * g + b    # (1, C) params broadcast over T

    # ---- LayerNorm 1 ------------------------------------------------------
    xn = layer_norm(x, g1, bt1)

    # ---- fused Q/K/V projection: one (T,C) @ (C,3C) bf16 matmul -----------
    qkv = jnp.dot(xn.astype(jnp.bfloat16), wqkv_ref[...],
                  preferred_element_type=jnp.float32)          # (T, 3C) f32

    # ---- per-head causal attention, per-head proj accumulation ------------
    row = lax.broadcasted_iota(jnp.int32, (T, T), 0)
    col = lax.broadcasted_iota(jnp.int32, (T, T), 1)
    causal = col <= row

    sa = jnp.zeros((T, C), jnp.float32)
    for h in range(NUM_HEADS):
        lo = h * HEAD_SIZE
        hi = lo + HEAD_SIZE
        q = qkv[:, lo:hi].astype(jnp.bfloat16)                 # SCALE folded into W_q
        k = qkv[:, C + lo:C + hi].astype(jnp.bfloat16)
        v = qkv[:, 2 * C + lo:2 * C + hi].astype(jnp.bfloat16)

        s = jnp.einsum('td,sd->ts', q, k,
                       preferred_element_type=jnp.float32)     # (T, T)
        s = jnp.where(causal, s, NEG_INF)
        m = jnp.max(s, axis=-1, keepdims=True)
        p = jnp.exp(s - m)
        wei = p / jnp.sum(p, axis=-1, keepdims=True)           # exact softmax
        ho = jnp.dot(wei.astype(jnp.bfloat16), v,
                     preferred_element_type=jnp.float32)       # (T, hs)
        # accumulate directly into the output projection (lane-dense N=C)
        sa = sa + jnp.dot(ho.astype(jnp.bfloat16), wp_ref[lo:hi, :],
                          preferred_element_type=jnp.float32)

    x1 = x + sa + bp                                           # residual 1

    # ---- LayerNorm 2 + FeedForward + residual ------------------------------
    x1n = layer_norm(x1, g2, bt2)
    h1 = jnp.dot(x1n.astype(jnp.bfloat16), w1_ref[...],
                 preferred_element_type=jnp.float32) + b1_ref[...]
    h1 = jnp.maximum(h1, 0.0)                                  # ReLU
    ff = jnp.dot(h1.astype(jnp.bfloat16), w2_ref[...],
                 preferred_element_type=jnp.float32) + bf2

    o_ref[0] = x1 + ff                                         # residual 2


# -------------------- wrapper ---------------------------------------------
@jax.jit
def transformer_block(x, params8, w_qkv, w_proj_t, w1_t, b1, w2_t):
    B, T, C = x.shape
    F = w1_t.shape[1]
    return pl.pallas_call(
        _block_kernel,
        out_shape=jax.ShapeDtypeStruct((B, T, C), jnp.float32),
        grid=(B,),
        in_specs=[
            pl.BlockSpec((1, T, C),  lambda b: (b, 0, 0)),   # x
            pl.BlockSpec((8, C),     lambda b: (0, 0)),      # packed small params
            pl.BlockSpec((C, 3 * C), lambda b: (0, 0)),      # W_qkv (stacked, bf16)
            pl.BlockSpec((C, C),     lambda b: (0, 0)),      # W_proj^T (bf16)
            pl.BlockSpec((C, F),     lambda b: (0, 0)),      # W1^T (bf16)
            pl.BlockSpec((1, F),     lambda b: (0, 0)),      # b1
            pl.BlockSpec((F, C),     lambda b: (0, 0)),      # W2^T (bf16)
        ],
        out_specs=pl.BlockSpec((1, T, C), lambda b: (b, 0, 0)),  # lane-dense (C=128)
        compiler_params=pltpu.CompilerParams(
            dimension_semantics=("parallel",)),              # 2 TCs on v7x split B
    )(x, params8, w_qkv, w_proj_t, w1_t, b1, w2_t)


# -------------------- pure-JAX reference (same bf16 dot semantics) ---------
def _reference(x, params8, w_qkv, w_proj_t, w1_t, b1, w2_t):
    B, T, C = x.shape
    g1  = params8[_ROW_G1]
    bt1 = params8[_ROW_B1]
    bp  = params8[_ROW_BP]
    g2  = params8[_ROW_G2]
    bt2 = params8[_ROW_B2]
    bf2 = params8[_ROW_BF2]

    def ln(v, g, b):
        mu = v.mean(-1, keepdims=True)
        d = v - mu
        var = (d * d).mean(-1, keepdims=True)
        return d * lax.rsqrt(var + EPS) * g + b

    xn = ln(x, g1, bt1)
    qkv = jnp.einsum('btc,cd->btd', xn.astype(jnp.bfloat16), w_qkv,
                     preferred_element_type=jnp.float32)
    mask = jnp.tril(jnp.ones((T, T), dtype=bool))
    sa = jnp.zeros((B, T, C), jnp.float32)
    for h in range(NUM_HEADS):
        lo, hi = h * HEAD_SIZE, (h + 1) * HEAD_SIZE
        q = qkv[..., lo:hi].astype(jnp.bfloat16)
        k = qkv[..., C + lo:C + hi].astype(jnp.bfloat16)
        v = qkv[..., 2 * C + lo:2 * C + hi].astype(jnp.bfloat16)
        s = jnp.einsum('bti,bsi->bts', q, k, preferred_element_type=jnp.float32)
        s = jnp.where(mask, s, NEG_INF)
        m = s.max(-1, keepdims=True)
        p = jnp.exp(s - m)
        wei = p / p.sum(-1, keepdims=True)
        ho = jnp.einsum('bts,bsi->bti', wei.astype(jnp.bfloat16), v,
                        preferred_element_type=jnp.float32)
        sa = sa + jnp.einsum('bti,ic->btc', ho.astype(jnp.bfloat16),
                             w_proj_t[lo:hi, :],
                             preferred_element_type=jnp.float32)
    x1 = x + sa + bp
    x1n = ln(x1, g2, bt2)
    h1 = jnp.einsum('btc,cf->btf', x1n.astype(jnp.bfloat16), w1_t,
                    preferred_element_type=jnp.float32) + b1[0]
    h1 = jnp.maximum(h1, 0.0)
    ff = jnp.einsum('btf,fc->btc', h1.astype(jnp.bfloat16), w2_t,
                    preferred_element_type=jnp.float32) + bf2
    return x1 + ff


if __name__ == "__main__":
    key = jax.random.PRNGKey(0)
    ks = jax.random.split(key, 12)

    x      = jax.random.normal(ks[0], (BATCH, SEQ, N_EMBED), jnp.float32)
    g1     = 1.0 + 0.1 * jax.random.normal(ks[1], (N_EMBED,), jnp.float32)
    beta1  = 0.1 * jax.random.normal(ks[2], (N_EMBED,), jnp.float32)
    # Q|K|V stacked: columns [0:C)=Q heads, [C:2C)=K heads, [2C:3C)=V heads
    w_qkv  = jax.random.normal(ks[3], (N_EMBED, 3 * N_EMBED), jnp.float32) * (N_EMBED ** -0.5)
    # PyTorch Linear weight is (out, in); stored pre-transposed (in, out)
    w_proj = jax.random.normal(ks[4], (N_EMBED, N_EMBED), jnp.float32) * (N_EMBED ** -0.5)
    b_proj = 0.01 * jax.random.normal(ks[5], (N_EMBED,), jnp.float32)
    g2     = 1.0 + 0.1 * jax.random.normal(ks[6], (N_EMBED,), jnp.float32)
    beta2  = 0.1 * jax.random.normal(ks[7], (N_EMBED,), jnp.float32)
    w1_t   = jax.random.normal(ks[8], (N_EMBED, FFN_DIM), jnp.float32) * (N_EMBED ** -0.5)
    b1     = 0.01 * jax.random.normal(ks[9], (1, FFN_DIM), jnp.float32)
    w2_t   = jax.random.normal(ks[10], (FFN_DIM, N_EMBED), jnp.float32) * (FFN_DIM ** -0.5)
    b2     = 0.01 * jax.random.normal(ks[11], (N_EMBED,), jnp.float32)

    # ---- one-time parameter preparation (not per call) --------------------
    # Fold the module's `* C**-0.5` score scaling into the Q weight columns:
    # (xn @ (Wq*s)) @ K^T == ((xn @ Wq) @ K^T) * s.
    w_qkv_prep = w_qkv.at[:, :N_EMBED].multiply(SCALE)
    w_qkv_bf   = w_qkv_prep.astype(jnp.bfloat16)
    w_proj_bf  = w_proj.astype(jnp.bfloat16)
    w1_bf      = w1_t.astype(jnp.bfloat16)
    w2_bf      = w2_t.astype(jnp.bfloat16)
    params8 = jnp.zeros((8, N_EMBED), jnp.float32)
    params8 = (params8.at[_ROW_G1].set(g1).at[_ROW_B1].set(beta1)
                       .at[_ROW_BP].set(b_proj).at[_ROW_G2].set(g2)
                       .at[_ROW_B2].set(beta2).at[_ROW_BF2].set(b2))

    out = transformer_block(x, params8, w_qkv_bf, w_proj_bf, w1_bf, b1, w2_bf)
    out = jax.block_until_ready(out)

    ref = _reference(x, params8, w_qkv_bf, w_proj_bf, w1_bf, b1, w2_bf)

    assert out.shape == (BATCH, SEQ, N_EMBED)
    assert jnp.allclose(out, ref, atol=2e-3, rtol=2e-3), "mismatch vs reference"

    print("KERNEL_OK")
</pallas_src>

<mosaic_0001>
module attributes {stable_mosaic.version = 11 : i64} {
  func.func @_block_kernel(%arg0: i32, %arg1: memref<1x16x128xf32, #tpu.memory_space<vmem>>, %arg2: memref<8x128xf32, #tpu.memory_space<vmem>>, %arg3: memref<128x384xbf16, #tpu.memory_space<vmem>>, %arg4: memref<128x128xbf16, #tpu.memory_space<vmem>>, %arg5: memref<128x512xbf16, #tpu.memory_space<vmem>>, %arg6: memref<1x512xf32, #tpu.memory_space<vmem>>, %arg7: memref<512x128xbf16, #tpu.memory_space<vmem>>, %arg8: memref<1x16x128xf32, #tpu.memory_space<vmem>>) attributes {dimension_semantics = [#tpu.dimension_semantics<parallel>], iteration_bounds = array<i64: 2>, scalar_prefetch = 0 : i64, scratch_operands = 0 : i64, tpu.core_type = #tpu.core_type<tc>, window_params = [{transform_indices = @transform_0, window_bounds = array<i64: 1, 16, 128>}, {pipeline_mode = #tpu.pipeline_mode<synchronous>, transform_indices = @transform_1, window_bounds = array<i64: 8, 128>}, {pipeline_mode = #tpu.pipeline_mode<synchronous>, transform_indices = @transform_2, window_bounds = array<i64: 128, 384>}, {pipeline_mode = #tpu.pipeline_mode<synchronous>, transform_indices = @transform_3, window_bounds = array<i64: 128, 128>}, {pipeline_mode = #tpu.pipeline_mode<synchronous>, transform_indices = @transform_4, window_bounds = array<i64: 128, 512>}, {pipeline_mode = #tpu.pipeline_mode<synchronous>, transform_indices = @transform_5, window_bounds = array<i64: 1, 512>}, {pipeline_mode = #tpu.pipeline_mode<synchronous>, transform_indices = @transform_6, window_bounds = array<i64: 512, 128>}, {transform_indices = @transform_7, window_bounds = array<i64: 1, 16, 128>}]} {
    %c0 = arith.constant 0 : index
    %c0_0 = arith.constant 0 : index
    %c0_1 = arith.constant 0 : index
    %0 = vector.load %arg1[%c0, %c0_0, %c0_1] : memref<1x16x128xf32, #tpu.memory_space<vmem>>, vector<1x16x128xf32>
    %1 = vector.shape_cast %0 : vector<1x16x128xf32> to vector<16x128xf32>
    %c0_2 = arith.constant 0 : index
    %c0_3 = arith.constant 0 : index
    %2 = vector.load %arg2[%c0_2, %c0_3] : memref<8x128xf32, #tpu.memory_space<vmem>>, vector<1x128xf32>
    %c1 = arith.constant 1 : index
    %c0_4 = arith.constant 0 : index
    %3 = vector.load %arg2[%c1, %c0_4] : memref<8x128xf32, #tpu.memory_space<vmem>>, vector<1x128xf32>
    %c2 = arith.constant 2 : index
    %c0_5 = arith.constant 0 : index
    %4 = vector.load %arg2[%c2, %c0_5] : memref<8x128xf32, #tpu.memory_space<vmem>>, vector<1x128xf32>
    %c3 = arith.constant 3 : index
    %c0_6 = arith.constant 0 : index
    %5 = vector.load %arg2[%c3, %c0_6] : memref<8x128xf32, #tpu.memory_space<vmem>>, vector<1x128xf32>
    %c4 = arith.constant 4 : index
    %c0_7 = arith.constant 0 : index
    %6 = vector.load %arg2[%c4, %c0_7] : memref<8x128xf32, #tpu.memory_space<vmem>>, vector<1x128xf32>
    %c5 = arith.constant 5 : index
    %c0_8 = arith.constant 0 : index
    %7 = vector.load %arg2[%c5, %c0_8] : memref<8x128xf32, #tpu.memory_space<vmem>>, vector<1x128xf32>
    %cst = arith.constant dense<0.000000e+00> : vector<16xf32>
    %8 = vector.multi_reduction <add>, %1, %cst [1] : vector<16x128xf32> to vector<16xf32>
    %9 = vector.shape_cast %8 : vector<16xf32> to vector<16x1xf32>
    %cst_9 = arith.constant 1.280000e+02 : f32
    %10 = vector.broadcast %cst_9 : f32 to vector<16x1xf32>
    %11 = arith.divf %9, %10 : vector<16x1xf32>
    %12 = vector.broadcast %11 : vector<16x1xf32> to vector<16x128xf32>
    %13 = arith.subf %1, %12 : vector<16x128xf32>
    %14 = arith.mulf %13, %13 : vector<16x128xf32>
    %cst_10 = arith.constant dense<0.000000e+00> : vector<16xf32>
    %15 = vector.multi_reduction <add>, %14, %cst_10 [1] : vector<16x128xf32> to vector<16xf32>
    %16 = vector.shape_cast %15 : vector<16xf32> to vector<16x1xf32>
    %cst_11 = arith.constant 1.280000e+02 : f32
    %17 = vector.broadcast %cst_11 : f32 to vector<16x1xf32>
    %18 = arith.divf %16, %17 : vector<16x1xf32>
    %cst_12 = arith.constant 9.99999974E-6 : f32
    %19 = vector.broadcast %cst_12 : f32 to vector<16x1xf32>
    %20 = arith.addf %18, %19 : vector<16x1xf32>
    %21 = math.rsqrt %20 : vector<16x1xf32>
    %22 = vector.broadcast %21 : vector<16x1xf32> to vector<16x128xf32>
    %23 = arith.mulf %13, %22 : vector<16x128xf32>
    %24 = vector.broadcast %2 : vector<1x128xf32> to vector<16x128xf32>
    %25 = arith.mulf %23, %24 : vector<16x128xf32>
    %26 = vector.broadcast %3 : vector<1x128xf32> to vector<16x128xf32>
    %27 = arith.addf %25, %26 : vector<16x128xf32>
    %28 = arith.truncf %27 : vector<16x128xf32> to vector<16x128xbf16>
    %c0_13 = arith.constant 0 : index
    %c0_14 = arith.constant 0 : index
    %29 = vector.load %arg3[%c0_13, %c0_14] : memref<128x384xbf16, #tpu.memory_space<vmem>>, vector<128x384xbf16>
    %cst_15 = arith.constant dense<0.000000e+00> : vector<16x384xf32>
    %30 = tpu.matmul %28, %29, %cst_15 {dimension_numbers = #tpu.dot_dimension_numbers<[1], [0], [0], [1], [0, 0, 1, 1], [], []>} : vector<16x128xbf16>, vector<128x384xbf16>, vector<16x384xf32> -> vector<16x384xf32>
    %31 = tpu.iota {dimensions = array<i32: 0>} : vector<16x16xi32>
    %32 = tpu.iota {dimensions = array<i32: 1>} : vector<16x16xi32>
    %33 = arith.cmpi sle, %32, %31 : vector<16x16xi32>
    %cst_16 = arith.constant 0.000000e+00 : f32
    %34 = vector.broadcast %cst_16 : f32 to vector<16x128xf32>
    %35 = vector.extract_strided_slice %30 {offsets = [0, 0], sizes = [16, 32], strides = [1, 1]} : vector<16x384xf32> to vector<16x32xf32>
    %36 = arith.truncf %35 : vector<16x32xf32> to vector<16x32xbf16>
    %37 = vector.extract_strided_slice %30 {offsets = [0, 128], sizes = [16, 32], strides = [1, 1]} : vector<16x384xf32> to vector<16x32xf32>
    %38 = arith.truncf %37 : vector<16x32xf32> to vector<16x32xbf16>
    %39 = vector.extract_strided_slice %30 {offsets = [0, 256], sizes = [16, 32], strides = [1, 1]} : vector<16x384xf32> to vector<16x32xf32>
    %40 = arith.truncf %39 : vector<16x32xf32> to vector<16x32xbf16>
    "tpu.trace_start"() <{level = 10 : i32, message = "td,sd->ts"}> : () -> ()
    %cst_17 = arith.constant dense<0.000000e+00> : vector<16x16xf32>
    %41 = tpu.matmul %36, %38, %cst_17 {dimension_numbers = #tpu.dot_dimension_numbers<[1], [1], [0], [0], [0, 0, 1, 0], [], []>} : vector<16x32xbf16>, vector<16x32xbf16>, vector<16x16xf32> -> vector<16x16xf32>
    %cst_18 = arith.constant -1.000000e+30 : f32
    "tpu.trace_stop"() : () -> ()
    %42 = vector.broadcast %cst_18 : f32 to vector<16x16xf32>
    %43 = arith.select %33, %41, %42 : vector<16x16xi1>, vector<16x16xf32>
    %cst_19 = arith.constant dense<0xFF800000> : vector<16xf32>
    %44 = vector.multi_reduction <maximumf>, %43, %cst_19 [1] : vector<16x16xf32> to vector<16xf32>
    %45 = vector.shape_cast %44 : vector<16xf32> to vector<16x1xf32>
    %46 = vector.broadcast %45 : vector<16x1xf32> to vector<16x16xf32>
    %47 = arith.subf %43, %46 : vector<16x16xf32>
    %48 = math.exp %47 : vector<16x16xf32>
    %cst_20 = arith.constant dense<0.000000e+00> : vector<16xf32>
    %49 = vector.multi_reduction <add>, %48, %cst_20 [1] : vector<16x16xf32> to vector<16xf32>
    %50 = vector.shape_cast %49 : vector<16xf32> to vector<16x1xf32>
    %51 = vector.broadcast %50 : vector<16x1xf32> to vector<16x16xf32>
    %52 = arith.divf %48, %51 : vector<16x16xf32>
    %53 = arith.truncf %52 : vector<16x16xf32> to vector<16x16xbf16>
    %cst_21 = arith.constant dense<0.000000e+00> : vector<16x32xf32>
    %54 = tpu.matmul %53, %40, %cst_21 {dimension_numbers = #tpu.dot_dimension_numbers<[1], [0], [0], [1], [0, 0, 1, 1], [], []>} : vector<16x16xbf16>, vector<16x32xbf16>, vector<16x32xf32> -> vector<16x32xf32>
    %55 = arith.truncf %54 : vector<16x32xf32> to vector<16x32xbf16>
    %c0_22 = arith.constant 0 : index
    %c0_23 = arith.constant 0 : index
    %56 = vector.load %arg4[%c0_22, %c0_23] : memref<128x128xbf16, #tpu.memory_space<vmem>>, vector<32x128xbf16>
    %cst_24 = arith.constant dense<0.000000e+00> : vector<16x128xf32>
    %57 = tpu.matmul %55, %56, %cst_24 {dimension_numbers = #tpu.dot_dimension_numbers<[1], [0], [0], [1], [0, 0, 1, 1], [], []>} : vector<16x32xbf16>, vector<32x128xbf16>, vector<16x128xf32> -> vector<16x128xf32>
    %58 = arith.addf %34, %57 : vector<16x128xf32>
    %59 = vector.extract_strided_slice %30 {offsets = [0, 32], sizes = [16, 32], strides = [1, 1]} : vector<16x384xf32> to vector<16x32xf32>
    %60 = arith.truncf %59 : vector<16x32xf32> to vector<16x32xbf16>
    %61 = vector.extract_strided_slice %30 {offsets = [0, 160], sizes = [16, 32], strides = [1, 1]} : vector<16x384xf32> to vector<16x32xf32>
    %62 = arith.truncf %61 : vector<16x32xf32> to vector<16x32xbf16>
    %63 = vector.extract_strided_slice %30 {offsets = [0, 288], sizes = [16, 32], strides = [1, 1]} : vector<16x384xf32> to vector<16x32xf32>
    %64 = arith.truncf %63 : vector<16x32xf32> to vector<16x32xbf16>
    "tpu.trace_start"() <{level = 10 : i32, message = "td,sd->ts"}> : () -> ()
    %cst_25 = arith.constant dense<0.000000e+00> : vector<16x16xf32>
    %65 = tpu.matmul %60, %62, %cst_25 {dimension_numbers = #tpu.dot_dimension_numbers<[1], [1], [0], [0], [0, 0, 1, 0], [], []>} : vector<16x32xbf16>, vector<16x32xbf16>, vector<16x16xf32> -> vector<16x16xf32>
    %cst_26 = arith.constant -1.000000e+30 : f32
    "tpu.trace_stop"() : () -> ()
    %66 = vector.broadcast %cst_26 : f32 to vector<16x16xf32>
    %67 = arith.select %33, %65, %66 : vector<16x16xi1>, vector<16x16xf32>
    %cst_27 = arith.constant dense<0xFF800000> : vector<16xf32>
    %68 = vector.multi_reduction <maximumf>, %67, %cst_27 [1] : vector<16x16xf32> to vector<16xf32>
    %69 = vector.shape_cast %68 : vector<16xf32> to vector<16x1xf32>
    %70 = vector.broadcast %69 : vector<16x1xf32> to vector<16x16xf32>
    %71 = arith.subf %67, %70 : vector<16x16xf32>
    %72 = math.exp %71 : vector<16x16xf32>
    %cst_28 = arith.constant dense<0.000000e+00> : vector<16xf32>
    %73 = vector.multi_reduction <add>, %72, %cst_28 [1] : vector<16x16xf32> to vector<16xf32>
    %74 = vector.shape_cast %73 : vector<16xf32> to vector<16x1xf32>
    %75 = vector.broadcast %74 : vector<16x1xf32> to vector<16x16xf32>
    %76 = arith.divf %72, %75 : vector<16x16xf32>
    %77 = arith.truncf %76 : vector<16x16xf32> to vector<16x16xbf16>
    %cst_29 = arith.constant dense<0.000000e+00> : vector<16x32xf32>
    %78 = tpu.matmul %77, %64, %cst_29 {dimension_numbers = #tpu.dot_dimension_numbers<[1], [0], [0], [1], [0, 0, 1, 1], [], []>} : vector<16x16xbf16>, vector<16x32xbf16>, vector<16x32xf32> -> vector<16x32xf32>
    %79 = arith.truncf %78 : vector<16x32xf32> to vector<16x32xbf16>
    %c32 = arith.constant 32 : index
    %c0_30 = arith.constant 0 : index
    %80 = vector.load %arg4[%c32, %c0_30] : memref<128x128xbf16, #tpu.memory_space<vmem>>, vector<32x128xbf16>
    %cst_31 = arith.constant dense<0.000000e+00> : vector<16x128xf32>
    %81 = tpu.matmul %79, %80, %cst_31 {dimension_numbers = #tpu.dot_dimension_numbers<[1], [0], [0], [1], [0, 0, 1, 1], [], []>} : vector<16x32xbf16>, vector<32x128xbf16>, vector<16x128xf32> -> vector<16x128xf32>
    %82 = arith.addf %58, %81 : vector<16x128xf32>
    %83 = vector.extract_strided_slice %30 {offsets = [0, 64], sizes = [16, 32], strides = [1, 1]} : vector<16x384xf32> to vector<16x32xf32>
    %84 = arith.truncf %83 : vector<16x32xf32> to vector<16x32xbf16>
    %85 = vector.extract_strided_slice %30 {offsets = [0, 192], sizes = [16, 32], strides = [1, 1]} : vector<16x384xf32> to vector<16x32xf32>
    %86 = arith.truncf %85 : vector<16x32xf32> to vector<16x32xbf16>
    %87 = vector.extract_strided_slice %30 {offsets = [0, 320], sizes = [16, 32], strides = [1, 1]} : vector<16x384xf32> to vector<16x32xf32>
    %88 = arith.truncf %87 : vector<16x32xf32> to vector<16x32xbf16>
    "tpu.trace_start"() <{level = 10 : i32, message = "td,sd->ts"}> : () -> ()
    %cst_32 = arith.constant dense<0.000000e+00> : vector<16x16xf32>
    %89 = tpu.matmul %84, %86, %cst_32 {dimension_numbers = #tpu.dot_dimension_numbers<[1], [1], [0], [0], [0, 0, 1, 0], [], []>} : vector<16x32xbf16>, vector<16x32xbf16>, vector<16x16xf32> -> vector<16x16xf32>
    %cst_33 = arith.constant -1.000000e+30 : f32
    "tpu.trace_stop"() : () -> ()
    %90 = vector.broadcast %cst_33 : f32 to vector<16x16xf32>
    %91 = arith.select %33, %89, %90 : vector<16x16xi1>, vector<16x16xf32>
    %cst_34 = arith.constant dense<0xFF800000> : vector<16xf32>
    %92 = vector.multi_reduction <maximumf>, %91, %cst_34 [1] : vector<16x16xf32> to vector<16xf32>
    %93 = vector.shape_cast %92 : vector<16xf32> to vector<16x1xf32>
    %94 = vector.broadcast %93 : vector<16x1xf32> to vector<16x16xf32>
    %95 = arith.subf %91, %94 : vector<16x16xf32>
    %96 = math.exp %95 : vector<16x16xf32>
    %cst_35 = arith.constant dense<0.000000e+00> : vector<16xf32>
    %97 = vector.multi_reduction <add>, %96, %cst_35 [1] : vector<16x16xf32> to vector<16xf32>
    %98 = vector.shape_cast %97 : vector<16xf32> to vector<16x1xf32>
    %99 = vector.broadcast %98 : vector<16x1xf32> to vector<16x16xf32>
    %100 = arith.divf %96, %99 : vector<16x16xf32>
    %101 = arith.truncf %100 : vector<16x16xf32> to vector<16x16xbf16>
    %cst_36 = arith.constant dense<0.000000e+00> : vector<16x32xf32>
    %102 = tpu.matmul %101, %88, %cst_36 {dimension_numbers = #tpu.dot_dimension_numbers<[1], [0], [0], [1], [0, 0, 1, 1], [], []>} : vector<16x16xbf16>, vector<16x32xbf16>, vector<16x32xf32> -> vector<16x32xf32>
    %103 = arith.truncf %102 : vector<16x32xf32> to vector<16x32xbf16>
    %c64 = arith.constant 64 : index
    %c0_37 = arith.constant 0 : index
    %104 = vector.load %arg4[%c64, %c0_37] : memref<128x128xbf16, #tpu.memory_space<vmem>>, vector<32x128xbf16>
    %cst_38 = arith.constant dense<0.000000e+00> : vector<16x128xf32>
    %105 = tpu.matmul %103, %104, %cst_38 {dimension_numbers = #tpu.dot_dimension_numbers<[1], [0], [0], [1], [0, 0, 1, 1], [], []>} : vector<16x32xbf16>, vector<32x128xbf16>, vector<16x128xf32> -> vector<16x128xf32>
    %106 = arith.addf %82, %105 : vector<16x128xf32>
    %107 = vector.extract_strided_slice %30 {offsets = [0, 96], sizes = [16, 32], strides = [1, 1]} : vector<16x384xf32> to vector<16x32xf32>
    %108 = arith.truncf %107 : vector<16x32xf32> to vector<16x32xbf16>
    %109 = vector.extract_strided_slice %30 {offsets = [0, 224], sizes = [16, 32], strides = [1, 1]} : vector<16x384xf32> to vector<16x32xf32>
    %110 = arith.truncf %109 : vector<16x32xf32> to vector<16x32xbf16>
    %111 = vector.extract_strided_slice %30 {offsets = [0, 352], sizes = [16, 32], strides = [1, 1]} : vector<16x384xf32> to vector<16x32xf32>
    %112 = arith.truncf %111 : vector<16x32xf32> to vector<16x32xbf16>
    "tpu.trace_start"() <{level = 10 : i32, message = "td,sd->ts"}> : () -> ()
    %cst_39 = arith.constant dense<0.000000e+00> : vector<16x16xf32>
    %113 = tpu.matmul %108, %110, %cst_39 {dimension_numbers = #tpu.dot_dimension_numbers<[1], [1], [0], [0], [0, 0, 1, 0], [], []>} : vector<16x32xbf16>, vector<16x32xbf16>, vector<16x16xf32> -> vector<16x16xf32>
    %cst_40 = arith.constant -1.000000e+30 : f32
    "tpu.trace_stop"() : () -> ()
    %114 = vector.broadcast %cst_40 : f32 to vector<16x16xf32>
    %115 = arith.select %33, %113, %114 : vector<16x16xi1>, vector<16x16xf32>
    %cst_41 = arith.constant dense<0xFF800000> : vector<16xf32>
    %116 = vector.multi_reduction <maximumf>, %115, %cst_41 [1] : vector<16x16xf32> to vector<16xf32>
    %117 = vector.shape_cast %116 : vector<16xf32> to vector<16x1xf32>
    %118 = vector.broadcast %117 : vector<16x1xf32> to vector<16x16xf32>
    %119 = arith.subf %115, %118 : vector<16x16xf32>
    %120 = math.exp %119 : vector<16x16xf32>
    %cst_42 = arith.constant dense<0.000000e+00> : vector<16xf32>
    %121 = vector.multi_reduction <add>, %120, %cst_42 [1] : vector<16x16xf32> to vector<16xf32>
    %122 = vector.shape_cast %121 : vector<16xf32> to vector<16x1xf32>
    %123 = vector.broadcast %122 : vector<16x1xf32> to vector<16x16xf32>
    %124 = arith.divf %120, %123 : vector<16x16xf32>
    %125 = arith.truncf %124 : vector<16x16xf32> to vector<16x16xbf16>
    %cst_43 = arith.constant dense<0.000000e+00> : vector<16x32xf32>
    %126 = tpu.matmul %125, %112, %cst_43 {dimension_numbers = #tpu.dot_dimension_numbers<[1], [0], [0], [1], [0, 0, 1, 1], [], []>} : vector<16x16xbf16>, vector<16x32xbf16>, vector<16x32xf32> -> vector<16x32xf32>
    %127 = arith.truncf %126 : vector<16x32xf32> to vector<16x32xbf16>
    %c96 = arith.constant 96 : index
    %c0_44 = arith.constant 0 : index
    %128 = vector.load %arg4[%c96, %c0_44] : memref<128x128xbf16, #tpu.memory_space<vmem>>, vector<32x128xbf16>
    %cst_45 = arith.constant dense<0.000000e+00> : vector<16x128xf32>
    %129 = tpu.matmul %127, %128, %cst_45 {dimension_numbers = #tpu.dot_dimension_numbers<[1], [0], [0], [1], [0, 0, 1, 1], [], []>} : vector<16x32xbf16>, vector<32x128xbf16>, vector<16x128xf32> -> vector<16x128xf32>
    %130 = arith.addf %106, %129 : vector<16x128xf32>
    %131 = arith.addf %1, %130 : vector<16x128xf32>
    %132 = vector.broadcast %4 : vector<1x128xf32> to vector<16x128xf32>
    %133 = arith.addf %131, %132 : vector<16x128xf32>
    %cst_46 = arith.constant dense<0.000000e+00> : vector<16xf32>
    %134 = vector.multi_reduction <add>, %133, %cst_46 [1] : vector<16x128xf32> to vector<16xf32>
    %135 = vector.shape_cast %134 : vector<16xf32> to vector<16x1xf32>
    %cst_47 = arith.constant 1.280000e+02 : f32
    %136 = vector.broadcast %cst_47 : f32 to vector<16x1xf32>
    %137 = arith.divf %135, %136 : vector<16x1xf32>
    %138 = vector.broadcast %137 : vector<16x1xf32> to vector<16x128xf32>
    %139 = arith.subf %133, %138 : vector<16x128xf32>
    %140 = arith.mulf %139, %139 : vector<16x128xf32>
    %cst_48 = arith.constant dense<0.000000e+00> : vector<16xf32>
    %141 = vector.multi_reduction <add>, %140, %cst_48 [1] : vector<16x128xf32> to vector<16xf32>
    %142 = vector.shape_cast %141 : vector<16xf32> to vector<16x1xf32>
    %cst_49 = arith.constant 1.280000e+02 : f32
    %143 = vector.broadcast %cst_49 : f32 to vector<16x1xf32>
    %144 = arith.divf %142, %143 : vector<16x1xf32>
    %cst_50 = arith.constant 9.99999974E-6 : f32
    %145 = vector.broadcast %cst_50 : f32 to vector<16x1xf32>
    %146 = arith.addf %144, %145 : vector<16x1xf32>
    %147 = math.rsqrt %146 : vector<16x1xf32>
    %148 = vector.broadcast %147 : vector<16x1xf32> to vector<16x128xf32>
    %149 = arith.mulf %139, %148 : vector<16x128xf32>
    %150 = vector.broadcast %5 : vector<1x128xf32> to vector<16x128xf32>
    %151 = arith.mulf %149, %150 : vector<16x128xf32>
    %152 = vector.broadcast %6 : vector<1x128xf32> to vector<16x128xf32>
    %153 = arith.addf %151, %152 : vector<16x128xf32>
    %154 = arith.truncf %153 : vector<16x128xf32> to vector<16x128xbf16>
    %c0_51 = arith.constant 0 : index
    %c0_52 = arith.constant 0 : index
    %155 = vector.load %arg5[%c0_51, %c0_52] : memref<128x512xbf16, #tpu.memory_space<vmem>>, vector<128x512xbf16>
    %cst_53 = arith.constant dense<0.000000e+00> : vector<16x512xf32>
    %156 = tpu.matmul %154, %155, %cst_53 {dimension_numbers = #tpu.dot_dimension_numbers<[1], [0], [0], [1], [0, 0, 1, 1], [], []>} : vector<16x128xbf16>, vector<128x512xbf16>, vector<16x512xf32> -> vector<16x512xf32>
    %c0_54 = arith.constant 0 : index
    %c0_55 = arith.constant 0 : index
    %157 = vector.load %arg6[%c0_54, %c0_55] : memref<1x512xf32, #tpu.memory_space<vmem>>, vector<1x512xf32>
    %158 = vector.broadcast %157 : vector<1x512xf32> to vector<16x512xf32>
    %159 = arith.addf %156, %158 : vector<16x512xf32>
    %cst_56 = arith.constant 0.000000e+00 : f32
    %160 = vector.broadcast %cst_56 : f32 to vector<16x512xf32>
    %161 = arith.maximumf %159, %160 : vector<16x512xf32>
    %162 = arith.truncf %161 : vector<16x512xf32> to vector<16x512xbf16>
    %c0_57 = arith.constant 0 : index
    %c0_58 = arith.constant 0 : index
    %163 = vector.load %arg7[%c0_57, %c0_58] : memref<512x128xbf16, #tpu.memory_space<vmem>>, vector<512x128xbf16>
    %cst_59 = arith.constant dense<0.000000e+00> : vector<16x128xf32>
    %164 = tpu.matmul %162, %163, %cst_59 {dimension_numbers = #tpu.dot_dimension_numbers<[1], [0], [0], [1], [0, 0, 1, 1], [], []>} : vector<16x512xbf16>, vector<512x128xbf16>, vector<16x128xf32> -> vector<16x128xf32>
    %165 = vector.broadcast %7 : vector<1x128xf32> to vector<16x128xf32>
    %166 = arith.addf %164, %165 : vector<16x128xf32>
    %167 = arith.addf %133, %166 : vector<16x128xf32>
    %c0_60 = arith.constant 0 : index
    %c0_61 = arith.constant 0 : index
    %c0_62 = arith.constant 0 : index
    %168 = vector.load %arg8[%c0_60, %c0_61, %c0_62] : memref<1x16x128xf32, #tpu.memory_space<vmem>>, vector<1x16x128xf32>
    %169 = vector.shape_cast %168 : vector<1x16x128xf32> to vector<16x128xf32>
    %170 = vector.shape_cast %167 : vector<16x128xf32> to vector<1x16x128xf32>
    tpu.vector_store %arg8[%c0_60, %c0_61, %c0_62], %170 {strides = array<i32>} : memref<1x16x128xf32, #tpu.memory_space<vmem>>, vector<1x16x128xf32>,
    return
  }
  func.func @transform_0(%arg0: i32) -> (i32, i32, i32) {
    %c0_i32 = arith.constant 0 : i32
    %c0_i32_0 = arith.constant 0 : i32
    %c0_i32_1 = arith.constant 0 : i32
    return %arg0, %c0_i32, %c0_i32_0 : i32, i32, i32
  }
  func.func @transform_1(%arg0: i32) -> (i32, i32) {
    %c0_i32 = arith.constant 0 : i32
    %c0_i32_0 = arith.constant 0 : i32
    %c0_i32_1 = arith.constant 0 : i32
    return %c0_i32, %c0_i32_0 : i32, i32
  }
  func.func @transform_2(%arg0: i32) -> (i32, i32) {
    %c0_i32 = arith.constant 0 : i32
    %c0_i32_0 = arith.constant 0 : i32
    %c0_i32_1 = arith.constant 0 : i32
    return %c0_i32, %c0_i32_0 : i32, i32
  }
  func.func @transform_3(%arg0: i32) -> (i32, i32) {
    %c0_i32 = arith.constant 0 : i32
    %c0_i32_0 = arith.constant 0 : i32
    %c0_i32_1 = arith.constant 0 : i32
    return %c0_i32, %c0_i32_0 : i32, i32
  }
  func.func @transform_4(%arg0: i32) -> (i32, i32) {
    %c0_i32 = arith.constant 0 : i32
    %c0_i32_0 = arith.constant 0 : i32
    %c0_i32_1 = arith.constant 0 : i32
    return %c0_i32, %c0_i32_0 : i32, i32
  }
  func.func @transform_5(%arg0: i32) -> (i32, i32) {
    %c0_i32 = arith.constant 0 : i32
    %c0_i32_0 = arith.constant 0 : i32
    %c0_i32_1 = arith.constant 0 : i32
    return %c0_i32, %c0_i32_0 : i32, i32
  }
  func.func @transform_6(%arg0: i32) -> (i32, i32) {
    %c0_i32 = arith.constant 0 : i32
    %c0_i32_0 = arith.constant 0 : i32
    %c0_i32_1 = arith.constant 0 : i32
    return %c0_i32, %c0_i32_0 : i32, i32
  }
  func.func @transform_7(%arg0: i32) -> (i32, i32, i32) {
    %c0_i32 = arith.constant 0 : i32
    %c0_i32_0 = arith.constant 0 : i32
    %c0_i32_1 = arith.constant 0 : i32
    return %arg0, %c0_i32, %c0_i32_0 : i32, i32, i32
  }
}

</mosaic_0001>

<bundles_post_ra>
// kernel: transformer_block.1
= control target key start
LH: loop header
LB: loop body
LE: loop exit
PB: predicated region body
PF: predicated region fallthrough
CT: control target
= control target key end

     0   :  { %12 = vsyncpa [#allocation3], 0  ;;  %s3650_s0 = inlined_call_operand.hbm [shape: f32[2,16,128], index: 0, kind: input, shape index: {}]   ;;  %s3651_s1 = inlined_call_operand.hbm [shape: f32[8,128], index: 1, kind: input, shape index: {}]   ;;  %s3652_s2 = inlined_call_operand.hbm [shape: bf16[128,384], index: 2, kind: input, shape index: {}]   ;;  %s3653_s3 = inlined_call_operand.hbm [shape: bf16[128,128], index: 3, kind: input, shape index: {}]   ;;  %s3654_s4 = inlined_call_operand.hbm [shape: bf16[128,512], index: 4, kind: input, shape index: {}]   ;;  %s3655_s5 = inlined_call_operand.vmem [shape: f32[1,512], index: 5, kind: input, shape index: {}]   ;;  %s3656_s6 = inlined_call_operand.hbm [shape: bf16[512,128], index: 6, kind: input, shape index: {}]   ;;  %s3657_s7 = inlined_call_operand.hbm [shape: f32[2,16,128], index: 7, kind: output, shape index: {}]  }
   0x1   :  { %14 = vsyncpa [#allocation3 + $0x1], 0 }
   0x2   :  { %15 = vsyncpa [#allocation6], 0 }
   0x3   :  { %16 = vsyncpa [#allocation9], 0 }
   0x4   :  { %17 = vsyncpa [#allocation12], 0 }
   0x5   :  { %18 = vsyncpa [#allocation4], 0 }
   0x6   :  { %20 = vsyncpa [#allocation4 + $0x1], 0  ;;  %s3150_s24 = smov 0   ;;  %s3152_s25 = smov 0  }
   0x7   :  { %s3154_s26 = smov 0   ;;  %s3156_s27 = smov 0  }
   0x8 LB: > { %s3087_s28 = smov [#allocation5]   ;;  %s3171_s30 = sadd.s32 4294967295, %s3085_s27   ;;  %s3085_s27 = sphi %s3156_s27, %s3684_s27   ;;  %s3081_s26 = sphi %s3154_s26, %s3683_s26   ;;  %s3077_s25 = sphi %s3152_s25, %s3682_s25   ;;  %s3073_s24 = sphi %s3150_s24, %s3681_s24  }
   0x9   : > { %s222_s29 = sshll.u32 %s3087_s28, 4  ;;  %p2242_p0 = scmp.ge.s32.totalorder %s3085_s27, 1  ;;  %s223_s29 = int_to_ptr.vmem [resolvable:$true] %s222_s29 }
   0xa   : > { %p3658_p1 = scmp.eq.s32.totalorder %s3171_s30, 0  ;;  %p209_p2 = scmp.lt.s32.totalorder %s3085_s27, 3 }
   0xb   : > { %s3088_s9 = smov [#allocation8]   ;;  %s3089_s12 = smov [#allocation7]  }
   0xc   : > { %p3176_p3 = pnand %p2242_p0, %p209_p2  ;;  %s245_s10 = sshll.u32 %s3088_s9, 4  ;;  %s3183_s10 = int_to_ptr.vmem [resolvable:$true] %s245_s10 }
   0xd   : > { %s232_s13 = sshll.u32 %s3089_s12, 4  ;;  %s2837_s16 = scalar_lea.hbm %s3651_s1, 128  ;;  %s3191_s13 = int_to_ptr.vmem [resolvable:$true] %s232_s13 }
   0xe   : > { %s3662_s8 = scalar_select %p3176_p3, 1, 0 }
   0xf   : > { %p2586_p5 = pneg %p3176_p3  ;;  %p2838_p7 = scmp.ne.s32.totalorder %s3651_s1, %s2837_s16 }
  0x10   : > { %p2844_p11 = scmp.lt.u32.totalorder %s2837_s16, %s3651_s1 }
  0x11   : > { %p3187_p6 = pnand %p2586_p5, %p3658_p1 }
  0x13   : > { %p3201_p8 = pneg %p3187_p6 }
  0x15   : > { %p2840_p9 = pnand %p3201_p8, %p2838_p7 }
  0x17   : > { %p2841_p10 = pneg %p2840_p9 }
  0x19   : > { %p2846_p12 = pnand %p2844_p11, %p2841_p10 }
  0x1b   : > { %2849 = shalt.err (!%p2846_p12)
}
  0x1c   : > { %s2850_s22 = scalar_lea.vmem %s223_s29, 128  ;;  %p2858_p5 = scmp.lt.s32.totalorder %s223_s29, %s223_s29 }
  0x1d   : > { %p2851_p13 = scmp.ne.s32.totalorder %s223_s29, %s2850_s22  ;;  %p2859_p4 = scmp.lt.s32.totalorder %s2850_s22, %s2850_s22 }
  0x1f   : > { %p2853_p0 = pnand %p2851_p13, %p3201_p8  ;;  %p2860_p1 = por %p2859_p4, %p2858_p5 }
  0x21   : > { %p2854_p2 = pneg %p2853_p0 }
  0x23   : > { %p2861_p3 = pnand %p2860_p1, %p2854_p2 }
  0x25   : > { %2864 = shalt.err (!%p2861_p3)
}
  0x26   : > { %2589 = dma.hbm_to_vmem [thread:$0]  (!%p3187_p6), %s3651_s1, 128, %s223_s29, [#allocation6]  }
  0x27   : > { %s2865_s14 = scalar_lea.hbm %s3653_s3, 1024 }
  0x28   : > { %p2866_p7 = scmp.ne.s32.totalorder %s3653_s3, %s2865_s14  ;;  %p2872_p1 = scmp.lt.u32.totalorder %s2865_s14, %s3653_s3 }
  0x2a   : > { %p2868_p9 = pnand %p2866_p7, %p3201_p8 }
  0x2c   : > { %p2869_p4 = pneg %p2868_p9 }
  0x2e   : > { %p2874_p3 = pnand %p2872_p1, %p2869_p4 }
  0x30   : > { %2877 = shalt.err (!%p2874_p3)
}
  0x31   : > { %s2878_s29 = scalar_lea.vmem %s3183_s10, 1024  ;;  %p2886_p13 = scmp.lt.s32.totalorder %s3183_s10, %s3183_s10 }
  0x32   : > { %p2879_p10 = scmp.ne.s32.totalorder %s3183_s10, %s2878_s29  ;;  %p2887_p0 = scmp.lt.s32.totalorder %s2878_s29, %s2878_s29 }
  0x34   : > { %p2881_p11 = pnand %p2879_p10, %p3201_p8  ;;  %p2888_p2 = por %p2887_p0, %p2886_p13 }
  0x36   : > { %p2882_p12 = pneg %p2881_p11 }
  0x38   : > { %p2889_p5 = pnand %p2888_p2, %p2882_p12 }
  0x3a   : > { %2892 = shalt.err (!%p2889_p5)
}
  0x3b   : > { %s3660_s20 = smov 64   ;;  %s3091_s21 = smov 4  }
  0x3c   : > { %2595 = dma.hbm_to_vmem [thread:$0]  (!%p3187_p6), %s3653_s3, 1024, %s3183_s10, [#allocation9], %s3660_s20, %s3660_s20, %s3091_s21  }
  0x3d   : > { %s2893_s12 = scalar_lea.hbm %s3652_s2, 3072 }
  0x3e   : > { %p2894_p7 = scmp.ne.s32.totalorder %s3652_s2, %s2893_s12  ;;  %p2900_p1 = scmp.lt.u32.totalorder %s2893_s12, %s3652_s2 }
  0x40   : > { %p2896_p9 = pnand %p2894_p7, %p3201_p8 }
  0x42   : > { %p2897_p4 = pneg %p2896_p9 }
  0x44   : > { %p2902_p3 = pnand %p2900_p1, %p2897_p4 }
  0x46   : > { %2905 = shalt.err (!%p2902_p3)
}
  0x47   : > { %s2906_s10 = scalar_lea.vmem %s3191_s13, 3072  ;;  %p2914_p13 = scmp.lt.s32.totalorder %s3191_s13, %s3191_s13 }
  0x48   : > { %p2907_p10 = scmp.ne.s32.totalorder %s3191_s13, %s2906_s10  ;;  %p2915_p0 = scmp.lt.s32.totalorder %s2906_s10, %s2906_s10 }
  0x4a   : > { %p2909_p11 = pnand %p2907_p10, %p3201_p8  ;;  %p2916_p2 = por %p2915_p0, %p2914_p13 }
  0x4c   : > { %p2910_p12 = pneg %p2909_p11 }
  0x4e   : > { %p2917_p5 = pnand %p2916_p2, %p2910_p12 }
  0x50   : > { %2920 = shalt.err (!%p2917_p5)
}
  0x51   : > { %s3092_s18 = smov 192   ;;  %s3093_s29 = smov 12  }
  0x52   : > { %2592 = dma.hbm_to_vmem [thread:$0]  (!%p3187_p6), %s3652_s2, 3072, %s3191_s13, [#allocation6], %s3092_s18, %s3092_s18, %s3093_s29  }
  0x53   : > { %s3094_s28 = smov [#allocation10]   ;;  %s2921_s15 = scalar_lea.hbm %s3654_s4, 4096 }
  0x54   : > { %s258_s9 = sshll.u32 %s3094_s28, 4  ;;  %p2922_p7 = scmp.ne.s32.totalorder %s3654_s4, %s2921_s15  ;;  %s259_s9 = int_to_ptr.vmem [resolvable:$true] %s258_s9 }
  0x55   : > { %p2928_p1 = scmp.lt.u32.totalorder %s2921_s15, %s3654_s4 }
  0x56   : > { %p2924_p9 = pnand %p2922_p7, %p3201_p8 }
  0x58   : > { %p2925_p4 = pneg %p2924_p9 }
  0x5a   : > { %p2930_p3 = pnand %p2928_p1, %p2925_p4 }
  0x5c   : > { %2933 = shalt.err (!%p2930_p3)
}
  0x5d   : > { %s2934_s13 = scalar_lea.vmem %s259_s9, 4096  ;;  %p2942_p13 = scmp.lt.s32.totalorder %s259_s9, %s259_s9 }
  0x5e   : > { %p2935_p10 = scmp.ne.s32.totalorder %s259_s9, %s2934_s13  ;;  %p2943_p0 = scmp.lt.s32.totalorder %s2934_s13, %s2934_s13 }
  0x60   : > { %p2937_p11 = pnand %p2935_p10, %p3201_p8  ;;  %p2944_p2 = por %p2943_p0, %p2942_p13 }
  0x62   : > { %p2938_p12 = pneg %p2937_p11 }
  0x64   : > { %p2945_p5 = pnand %p2944_p2, %p2938_p12 }
  0x66   : > { %2948 = shalt.err (!%p2945_p5)
}
  0x67   : > { %s3095_s18 = smov 256   ;;  %s3096_s29 = smov 16  }
  0x68   : > { %2598 = dma.hbm_to_vmem [thread:$0]  (!%p3187_p6), %s3654_s4, 4096, %s259_s9, [#allocation9], %s3095_s18, %s3095_s18, %s3096_s29  }
  0x69   : > { %s3097_s23 = smov [#allocation11]   ;;  %s2949_s15 = scalar_lea.hbm %s3656_s6, 4096 }
  0x6a   : > { %s274_s28 = sshll.u32 %s3097_s23, 4  ;;  %p2950_p7 = scmp.ne.s32.totalorder %s3656_s6, %s2949_s15  ;;  %s275_s28 = int_to_ptr.vmem [resolvable:$true] %s274_s28 }
  0x6b   : > { %p2956_p1 = scmp.lt.u32.totalorder %s2949_s15, %s3656_s6 }
  0x6c   : > { %p2952_p9 = pnand %p2950_p7, %p3201_p8 }
  0x6e   : > { %p2953_p4 = pneg %p2952_p9 }
  0x70   : > { %p2958_p3 = pnand %p2956_p1, %p2953_p4 }
  0x72   : > { %2961 = shalt.err (!%p2958_p3)
}
  0x73   : > { %s2962_s9 = scalar_lea.vmem %s275_s28, 4096  ;;  %p2970_p13 = scmp.lt.s32.totalorder %s275_s28, %s275_s28 }
  0x74   : > { %p2963_p10 = scmp.ne.s32.totalorder %s275_s28, %s2962_s9  ;;  %p2971_p0 = scmp.lt.s32.totalorder %s2962_s9, %s2962_s9 }
  0x76   : > { %p2965_p11 = pnand %p2963_p10, %p3201_p8  ;;  %p2972_p2 = por %p2971_p0, %p2970_p13 }
  0x78   : > { %p2966_p12 = pneg %p2965_p11 }
  0x7a   : > { %p2973_p5 = pnand %p2972_p2, %p2966_p12 }
  0x7c   : > { %2976 = shalt.err (!%p2973_p5)
}
  0x7d   : > { %s3665_s18 = smov 64   ;;  %s2241_s11 = sadd.s32 4294967294, %s3085_s27  }
  0x7e   : > { %2601 = dma.hbm_to_vmem [thread:$0]  (!%p3187_p6), %s3656_s6, 4096, %s275_s28, [#allocation12], %s3665_s18, %s3665_s18, %s3091_s21  }
  0x7f   : > { %s3307_s19 = sadd.s32 1, %s3085_s27   ;;  %s33_s22 = sadd.s32 1, %s3081_s26 }
  0x80   : > { %s30_s23 = ssub.s32 %s3085_s27, %s3307_s19  ;;  %p40_p8 = scmp.ne.s32.totalorder %s3081_s26, %s3077_s25 }
  0x81   : > { %p31_p7 = scmp.eq.s32.totalorder %s30_s23, 0  ;;  %p41_p9 = scmp.eq.s32.totalorder %s3085_s27, 0 }
  0x82   : > { %p46_p4 = scmp.ne.s32.totalorder %s3077_s25, %s3073_s24  ;;  %p196_p1 = scmp.eq.s32.totalorder %s3171_s30, 1 }
  0x83   : > { %s3319_s12 = scalar_select %p31_p7, %s3081_s26, %s33_s22  }
  0x84   : > { %p42_p3 = por %p41_p9, %p40_p8  ;;  %p3666_p10 = scmp.eq.s32.totalorder %s3171_s30, 0 }
  0x85   : > { %p3327_p6 = por %p196_p1, %p40_p8  ;;  %p202_p12 = scmp.eq.s32.totalorder %s2241_s11, 1 }
  0x86   : > { %p3323_p11 = por %p3666_p10, %p46_p4  ;;  %p2615_p13 = scmp.lt.s32.totalorder %s3085_s27, 2 }
  0x87   : > { %s3668_s21 = scalar_select %p3327_p6, 1, 0 }
  0x88   : > { %s288_s28 = sand.u32 1, %s3081_s26   ;;  %p3333_p0 = por %p202_p12, %p46_p4 }
  0x89   : > { %s2249_s16 = sshll.u32 %s288_s28, 4  ;;  %s2379_s17 = sshll.u32 %s3085_s27, 8 }
  0x8a   : > { %s3669_s15 = scalar_select %p3333_p0, 1, 0 }
  0x8b   : > { %s3341_s9 = scalar_lea.hbm %s3650_s0, %s2379_s17  ;;  %s292_s18 = scalar_lea.vmem [#allocation2], %s2249_s16 }
  0x8c   : > { %s299_s29 = sshll.u32 %s292_s18, 4  ;;  %p3343_p2 = pnand %p2615_p13, %p42_p3  ;;  %s3347_s29 = int_to_ptr.vmem [resolvable:$true] %s299_s29 }
  0x8d   : > { %s3349_s11 = scalar_lea.sflag [#allocation3], %s288_s28  ;;  %s2977_s22 = scalar_lea.hbm %s3341_s9, 256 }
  0x8e   : > { %p2978_p5 = scmp.ne.s32.totalorder %s3341_s9, %s2977_s22  ;;  %p2979_p8 = pneg %p3343_p2 }
  0x8f   : > { %s2982_s17 = scalar_lea.hbm %s3650_s0, 512  ;;  %p2983_p4 = scmp.lt.u32.totalorder %s3341_s9, %s3650_s0 }
  0x90   : > { %p2980_p7 = pnand %p2979_p8, %p2978_p5  ;;  %p2984_p1 = scmp.lt.u32.totalorder %s2982_s17, %s2977_s22 }
  0x91   : > { %p2986_p10 = scmp.lt.u32.totalorder %s2977_s22, %s3341_s9 }
  0x92   : > { %p2981_p9 = pneg %p2980_p7  ;;  %p2985_p3 = por %p2984_p1, %p2983_p4 }
  0x94   : > { %p2987_p12 = por %p2986_p10, %p2985_p3 }
  0x96   : > { %p2988_p13 = pnand %p2987_p12, %p2981_p9 }
  0x98   : > { %2991 = shalt.err (!%p2988_p13)
}
  0x99   : > { %s2992_s28 = scalar_lea.vmem %s3347_s29, 256  ;;  %s3098_s18 = smov [#allocation2]  }
  0x9a   : > { %p2993_p5 = scmp.ne.s32.totalorder %s3347_s29, %s2992_s28  ;;  %s2997_s23 = sshll.u32 %s3098_s18, 4  ;;  %s2998_s23 = int_to_ptr.vmem [resolvable:$false] %s2997_s23 }
  0x9b   : > { %s2999_s16 = scalar_lea.vmem %s2998_s23, 512  ;;  %p3000_p6 = scmp.lt.s32.totalorder %s3347_s29, %s2998_s23 }
  0x9c   : > { %p2995_p7 = pnand %p2993_p5, %p2979_p8  ;;  %p3001_p4 = scmp.lt.s32.totalorder %s2999_s16, %s2992_s28 }
  0x9e   : > { %p2996_p0 = pneg %p2995_p7  ;;  %p3002_p1 = por %p3001_p4, %p3000_p6 }
  0xa0   : > { %p3003_p3 = pnand %p3002_p1, %p2996_p0 }
  0xa2   : > { %3006 = shalt.err (!%p3003_p3)
}
  0xa3   : > { %s3099_s22 = smov 128   ;;  %s3100_s17 = smov 8  }
  0xa4   : > { %2605 = dma.hbm_to_vmem [thread:$0]  (!%p3343_p2), %s3341_s9, 256, %s3347_s29, %s3349_s11, %s3099_s22, %s3099_s22, %s3100_s17  }
  0xa5   : > { %p3671_p8 = scmp.ne.s32.totalorder %s3662_s8, 0 }
  0xa6   : > { %s3380_s10 = sand.u32 (!%p3671_p8), 1, %s3077_s25  }
  0xa7   : > { %311 = sbr.rel (%p3671_p8) target bundleno = 3881 (0xf29), region = 48  ;;  %s2253_s13 = sshll.u32 (!%p3671_p8), %s3380_s10, 4 }
  0xa8   : > { %s314_s28 = scalar_lea.sflag (!%p3671_p8), [#allocation3], %s3380_s10  ;;  %s3386_s18 = scalar_lea.vmem (!%p3671_p8), [#allocation2], %s2253_s13 }
  0xae   : > { %3052 = dma.done.wait (%p3323_p11), %s314_s28, 256  }
  0xaf   : > { %3054 = vsyncadd (%p3323_p11), %s314_s28, 4294967040  ;;  %p3672_p6 = scmp.eq.s32.totalorder %s3171_s30, 0 }
  0xb1   : > { %3056 = dma.done.wait (%p3672_p6), [#allocation6], 3200   ;;  %p3673_p0 = pmov %p3672_p6 }
  0xb3   : > { %3058 = vsyncadd (%p3673_p0), [#allocation6], 4294964096  ;;  %p3674_p2 = pmov %p3673_p0 }
  0xb4   : > { %p3675_p9 = pmov %p3673_p0 }
  0xb5   : > { %3060 = dma.done.wait (%p3674_p2), [#allocation9], 5120  }
  0xb6   : > { %3062 = vsyncadd (%p3675_p9), [#allocation9], 4294962176  ;;  %p3676_p10 = pmov %p3673_p0 }
  0xb7   : > { %p3677_p12 = pmov %p3673_p0 }
  0xb8   : > { %3064 = dma.done.wait (%p3676_p10), [#allocation12], 4096  }
  0xb9   : > { %3066 = vsyncadd (%p3677_p12), [#allocation12], 4294963200  ;;  %v369_v0 = vld [vmem:[%s3386_s18] sm:$0xff]  ;;  %v370_v1 = vld [vmem:[%s3386_s18 + $0x8] sm:$0xff]  ;;  %v3101_v4 = vmov 0.0   ;;  %v3102_v30 = vmov 0  }
  0xba   : > { %377 = vadd.xlane.f32.xlu0 %v369_v0  ;;  %v2675_v2 = vld [vmem:[#allocation7 + $0x4] ss:$12 sps:$4 sm:$0xff]   ;;  %v2677_v3 = vld [vmem:[#allocation7] ss:$12 sps:$4 sm:$0xff]   ;;  %2462 = vmatprep.subr.bf16.mxu1 %v3101_v4  ;;  %v2678_v5 = vld [vmem:[#allocation7 + $0x8] ss:$12 sps:$4 sm:$0xff]  }
  0xbb   : > { %v2679_v6 = vld [vmem:[#allocation7 + $0x1c] ss:$12 sps:$4 sm:$0xff]   ;;  %573 = vmatprep.subr.bf16.mxu0 %v2675_v2  ;;  %2463 = vmatpush3.bf16.msra.mxu1 %v2678_v5  ;;  %v2681_v15 = vld [vmem:[#allocation7 + $0x18] ss:$12 sps:$4 sm:$0xff]   ;;  %v2682_v16 = vld [vmem:[#allocation7 + $0x20] ss:$12 sps:$4 sm:$0xff]   ;;  %v657_v5 = vlaneseq }
  0xbc   : > { %574 = vmatpush1.bf16.msra.mxu0 %v2677_v3  ;;  %2464 = vmatprep.subr.bf16.mxu1 %v3101_v4  ;;  %v2683_v17 = vld [vmem:[#allocation7 + $0x34] ss:$12 sps:$4 sm:$0xff]   ;;  %v2685_v18 = vld [vmem:[#allocation7 + $0x30] ss:$12 sps:$4 sm:$0xff]   ;;  %v2686_v19 = vld [vmem:[#allocation7 + $0x38] ss:$12 sps:$4 sm:$0xff]  }
  0xbd   : > { %575 = vmatprep.subr.bf16.mxu0 %v2679_v6  ;;  %v2687_v20 = vld [vmem:[#allocation7 + $0x4c] ss:$12 sps:$4 sm:$0xff]   ;;  %v2689_v21 = vld [vmem:[#allocation7 + $0x48] ss:$12 sps:$4 sm:$0xff]   ;;  %v2690_v22 = vld [vmem:[#allocation7 + $0x50] ss:$12 sps:$4 sm:$0xff]   ;;  %605 = vmatprep.mubr.bf16.mxu0 %v3102_v30 }
  0xbe   : > { %379 = vadd.xlane.f32.xlu0 %v370_v1  ;;  %v2691_v23 = vld [vmem:[#allocation7 + $0x64] ss:$12 sps:$4 sm:$0xff]   ;;  %v2693_v24 = vld [vmem:[#allocation7 + $0x60] ss:$12 sps:$4 sm:$0xff]   ;;  %v2694_v25 = vld [vmem:[#allocation7 + $0x68] ss:$12 sps:$4 sm:$0xff]  }
  0xbf   : > { %2465 = vmatpush3.bf16.msra.mxu1 %v2682_v16  ;;  %v2695_v26 = vld [vmem:[#allocation7 + $0x7c] ss:$12 sps:$4 sm:$0xff]   ;;  %v2697_v27 = vld [vmem:[#allocation7 + $0x78] ss:$12 sps:$4 sm:$0xff]   ;;  %v2698_v28 = vld [vmem:[#allocation7 + $0x80] ss:$12 sps:$4 sm:$0xff]  }
  0xc0   : > { %576 = vmatpush1.bf16.msra.mxu0 %v2681_v15  ;;  %2466 = vmatprep.subr.bf16.mxu1 %v3101_v4  ;;  %v2699_v29 = vld [vmem:[#allocation7 + $0x94] ss:$12 sps:$4 sm:$0xff]   ;;  %vm3103_vm0 = vmmov 0   ;;  %v2701_v31 = vld [vmem:[#allocation7 + $0x90] ss:$12 sps:$4 sm:$0xff]   ;;  %vm667_vm1 = vcmask 261120  }
  0xc1   : > { %577 = vmatprep.subr.bf16.mxu0 %v2683_v17  ;;  %2478 = vmatprep.mubr.msk.bf16.mxu1 %vm3103_vm0, %v3101_v4  ;;  %v2702_v32 = vld [vmem:[#allocation7 + $0x98] ss:$12 sps:$4 sm:$0xff]   ;;  %v2705_v34 = vld [vmem:[#allocation7 + $0xa8] ss:$12 sps:$4 sm:$0xff]   ;;  %v2706_v35 = vld [vmem:[#allocation7 + $0xb0] ss:$12 sps:$4 sm:$0xff]  }
  0xc2   : > { %v2703_v33 = vld [vmem:[#allocation7 + $0xac] ss:$12 sps:$4 sm:$0xff]   ;;  %s3104_s8 = smov 96   ;;  %v3457_v6 = vshrl.u32 %v657_v5, 7  ;;  %vm717_vm3 = vcmask 130048   ;;  %s3105_s14 = smov 64  }
  0xc3   : > { %2467 = vmatpush3.bf16.msra.mxu1 %v2686_v19  ;;  %v2260_v44 = vld [vmem:[#allocation5] ss:$0 sm:$0xff]  ;;  %v2261_v48 = vld [vmem:[#allocation5 + $0x1] ss:$0 sm:$0xff]  ;;  %s3106_s9 = smov 32   ;;  %s367_s11 = scalar_lea.vmem [#allocation13], %s2253_s13 }
  0xc4   : > { %578 = vmatpush1.bf16.msra.mxu0 %v2685_v18  ;;  %2468 = vmatprep.subr.bf16.mxu1 %v3101_v4  ;;  %s2120_s23 = sshll.u32 %s367_s11, 4  ;;  %s2380_s16 = sshll.u32 %s3171_s30, 8  ;;  %s3600_s23 = int_to_ptr.vmem [resolvable:$true] %s2120_s23 }
  0xc5   : > { %579 = vmatprep.subr.bf16.mxu0 %v2687_v20  ;;  %s3605_s28 = scalar_lea.hbm %s3657_s7, %s2380_s16  ;;  %s2107_s13 = scalar_lea.sflag [#allocation4], %s3380_s10 }
  0xc6   : > { %p3678_p13 = scmp.ne.s32.totalorder %s3668_s21, 0  ;;  %s3107_s30 = smov [#allocation13]  }
  0xc7   : > { %2469 = vmatpush3.bf16.msra.mxu1 %v2690_v22 }
  0xc8   : > { %580 = vmatpush1.bf16.msra.mxu0 %v2689_v21  ;;  %2470 = vmatprep.subr.bf16.mxu1 %v3101_v4 }
  0xc9   : > { %581 = vmatprep.subr.bf16.mxu0 %v2691_v23 }
  0xcb   : > { %2471 = vmatpush3.bf16.msra.mxu1 %v2694_v25 }
  0xcc   : > { %582 = vmatpush1.bf16.msra.mxu0 %v2693_v24  ;;  %2472 = vmatprep.subr.bf16.mxu1 %v3101_v4 }
  0xcd   : > { %583 = vmatprep.subr.bf16.mxu0 %v2695_v26 }
  0xcf   : > { %2473 = vmatpush3.bf16.msra.mxu1 %v2698_v28 }
  0xd0   : > { %584 = vmatpush1.bf16.msra.mxu0 %v2697_v27  ;;  %2474 = vmatprep.subr.bf16.mxu1 %v3101_v4 }
  0xd1   : > { %585 = vmatprep.subr.bf16.mxu0 %v2699_v29 }
  0xd3   : > { %2475 = vmatpush3.bf16.msra.mxu1 %v2702_v32 }
  0xd4   : > { %586 = vmatpush1.bf16.msra.mxu0 %v2701_v31  ;;  %2476 = vmatprep.subr.bf16.mxu1 %v3101_v4 }
  0xd5   : > { %587 = vmatprep.subr.bf16.mxu0 %v2703_v33 }
  0xd7   : > { %2477 = vmatpush3.bf16.msra.mxu1 %v2706_v35 }
  0xd8   : > { %588 = vmatpush1.bf16.msra.mxu0 %v2705_v34  ;;  %2488 = vmatprep.subr.bf16.mxu1 %v3101_v4 }
  0xd9   : > { %2482 = vmatprep.subr.bf16.mxu0 %v3101_v4 }
 0x147   : > { %v378_v7 = vpop.xlane.xlu0 %377 }
 0x148   : > { %v382_v8 = vmul.f32 0.0078125, %v378_v7  ;;  %v3459_v7 = vand.u32 127, %v657_v5 }
 0x14a   : > { %v3408_v9 = vsub.f32 %v369_v0, %v382_v8  ;;  %v3462_v8 = vadd.s32 8, %v3457_v6  ;;  %vm662_vm2 = vcmp.le.s32.totalorder %v3459_v7, %v3457_v6 }
 0x14b   : > { %v380_v10 = vpop.xlane.xlu0 %379 }
 0x14c   : > { %v383_v11 = vmul.f32 0.0078125, %v380_v10  ;;  %v386_v12 = vmul.f32 %v3408_v9, %v3408_v9  ;;  %vm663_vm4 = vcmp.le.s32.totalorder %v3459_v7, %v3462_v8  ;;  %v2713_v8 = vld [vmem:[#allocation8 + $0x30] sm:$0xff]  }
 0x14e   : > { %v3412_v13 = vsub.f32 %v370_v1, %v383_v11  ;;  %388 = vadd.xlane.f32.xlu1 %v386_v12 }
 0x150   : > { %v387_v14 = vmul.f32 %v3412_v13, %v3412_v13 }
 0x152   : > { %390 = vadd.xlane.f32.xlu1 %v387_v14 }
 0x1db   : > { %v389_v36 = vpop.xlane.xlu1 %388 }
 0x1dc   : > { %v392_v37 = vmul.f32 0.0078125, %v389_v36 }
 0x1de   : > { %v394_v38 = vadd.f32 1e-05, %v392_v37 }
 0x1df   : > { %v391_v39 = vpop.xlane.xlu1 %390 }
 0x1e0   : > { %2795 = vrsqrt.f32 %v394_v38  ;;  %v393_v40 = vmul.f32 0.0078125, %v391_v39 }
 0x1e2   : > { %v395_v41 = vadd.f32 1e-05, %v393_v40 }
 0x1e4   : > { %2797 = vrsqrt.f32 %v395_v41 }
 0x1ea   : > { %v2796_v42 = vpop.eup %2795 }
 0x1eb   : > { %v398_v43 = vmul.f32 %v2796_v42, %v3408_v9 }
 0x1ed   : > { %v404_v47 = vmul.f32 %v2260_v44, %v398_v43 }
 0x1ee   : > { %v2798_v45 = vpop.eup %2797 }
 0x1ef   : > { %v399_v46 = vmul.f32 %v2798_v45, %v3412_v13  ;;  %v410_v50 = vadd.f32 %v2261_v48, %v404_v47 }
 0x1f1   : > { %v405_v49 = vmul.f32 %v2260_v44, %v399_v46 }
 0x1f3   : > { %v411_v51 = vadd.f32 %v2261_v48, %v405_v49 }
 0x1f5   : > { %v412_v52 = vpack.c.bf16 %v411_v51, %v410_v50 }
 0x1f7   : > { %606 = vmatmul.mubr.bf16.vlgmr.msra.gmra.mrb[0].mxu0 %v412_v52  ;;  %2479 = vmatmul.mubr.bf16.vlgmr.msra.gmra.mrb[0].mxu1 %v412_v52 }
 0x1f8   : > { %2484 = vmatprep.mubr.msk.bf16.mxu0 %vm3103_vm0, %v3101_v4  ;;  %2490 = vmatprep.mubr.msk.bf16.mxu1 %vm3103_vm0, %v3101_v4 }
 0x2ca   : > { %v607_v53 = vpop.f32.mrb[0].mxu0  ;;  %v650_v54 = vpop.f32.mrb[0].mxu1 }
 0x2cb   : > { %v609_v55 = vpop.f32.mrb[1].mxu0  ;;  %v2480_v56 = vpop.f32.mrb[1].mxu1 }
 0x2cc   : > { %v611_v57 = vpop.f32.mrb[2].mxu0  ;;  %v653_v58 = vpop.f32.mrb[2].mxu1 }
 0x2cd   : > { %v3433_v59 = vpack.c.bf16 %v611_v57, %v607_v53  ;;  %v3435_v60 = vpack.c.bf16 %v653_v58, %v650_v54  ;;  %v613_v61 = vpop.f32.mrb[3].mxu0  ;;  %v2481_v62 = vpop.f32.mrb[3].mxu1  ;;  %v2709_v53 = vld [vmem:[#allocation8 + $0x10] sm:$0xff]   ;;  %v2710_v54 = vld [vmem:[#allocation8 + $0x18] sm:$0xff]  }
 0x2ce   : > { %v3437_v63 = vpack.c.bf16 %v613_v61, %v609_v55 }
 0x2cf   : > { %2489 = vmatpush3.bf16.msra.mxu1 %v3435_v60  ;;  %791 = vrot.lane.b32.xlu1 %v3433_v59, %s3104_s8 }
 0x2d0   : > { %794 = vrot.lane.b32.xlu0 %v3437_v63, %s3104_s8  ;;  %v672_v0 = vsel %vm667_vm1, %v3437_v63, 0  ;;  %2500 = vmatprep.subr.bf16.mxu1 %v3101_v4 }
 0x2d1   : > { %2483 = vmatpush3.bf16.xpose.msra.mxu0 %v672_v0 }
 0x2d2   : > { %2494 = vmatprep.subr.bf16.mxu0 %v3101_v4 }
 0x2d8   : > { %2485 = vmatmul.mubr.msk.bf16.vlgmr.msra.gmra.mrb[4].mxu0 %vm667_vm1, %v3433_v59 }
 0x2d9   : > { %2496 = vmatprep.mubr.msk.bf16.mxu0 %vm3103_vm0, %v3101_v4 }
 0x341   : > { %v792_v3 = vpop.permute.xlu1 %791 }
 0x342   : > { %v795_v1 = vpop.permute.xlu0 %794 }
 0x343   : > { %v800_v2 = vsel %vm667_vm1, %v795_v1, 0  ;;  %v2707_v1 = vld [vmem:[#allocation8] sm:$0xff]  }
 0x344   : > { %2495 = vmatpush3.bf16.xpose.msra.mxu0 %v800_v2 }
 0x345   : > { %2506 = vmatprep.subr.bf16.mxu0 %v3101_v4 }
 0x34b   : > { %2497 = vmatmul.mubr.msk.bf16.vlgmr.msra.gmra.mrb[8].mxu0 %vm667_vm1, %v792_v3  ;;  %v2708_v3 = vld [vmem:[#allocation8 + $0x8] sm:$0xff]  }
 0x34c   : > { %2510 = vmatprep.mubr.msk.bf16.mxu0 %vm3103_vm0, %v3101_v4  ;;  %2507 = vmatpush3.bf16.msra.mxu0 %v2709_v53 }
 0x34d   : > { %2508 = vmatprep.subr.bf16.mxu0 %v3101_v4 }
 0x350   : > { %2509 = vmatpush3.bf16.msra.mxu0 %v2710_v54 }
 0x351   : > { %2522 = vmatprep.subr.bf16.mxu0 %v3101_v4 }
 0x3ab   : > { %v708_v9 = vpop.f32.mrb[4].mxu0 }
 0x3ac   : > { %v715_v10 = vsel %vm662_vm2, %v708_v9, -1e+30  ;;  %v2486_v11 = vpop.f32.mrb[5].mxu0 }
 0x3ad   : > { %v711_v12 = vpop.f32.mrb[6].mxu0  ;;  %v718_v13 = vsel %vm717_vm3, %v715_v10, -inf }
 0x3ae   : > { %v716_v14 = vsel %vm663_vm4, %v711_v12, -1e+30  ;;  %719 = vmax.xlane.f32.xlu1 %v718_v13  ;;  %v2487_v15 = vpop.f32.mrb[7].mxu0 }
 0x3af   : > { %v721_v16 = vsel %vm717_vm3, %v716_v14, -inf }
 0x3b0   : > { %722 = vmax.xlane.f32.xlu0 %v721_v16 }
 0x41e   : > { %v836_v17 = vpop.f32.mrb[8].mxu0 }
 0x41f   : > { %v843_v18 = vsel %vm662_vm2, %v836_v17, -1e+30  ;;  %v2498_v19 = vpop.f32.mrb[9].mxu0 }
 0x420   : > { %v839_v20 = vpop.f32.mrb[10].mxu0  ;;  %v845_v21 = vsel %vm717_vm3, %v843_v18, -inf }
 0x421   : > { %v844_v22 = vsel %vm663_vm4, %v839_v20, -1e+30  ;;  %846 = vmax.xlane.f32.xlu0 %v845_v21  ;;  %v2499_v23 = vpop.f32.mrb[11].mxu0 }
 0x422   : > { %v848_v24 = vsel %vm717_vm3, %v844_v22, -inf }
 0x423   : > { %849 = vmax.xlane.f32.xlu1 %v848_v24 }
 0x43b   : > { %v720_v25 = vpop.xlane.xlu1 %719 }
 0x43c   : > { %v724_v26 = vsub.f32 %v715_v10, %v720_v25 }
 0x43d   : > { %v723_v27 = vpop.xlane.xlu0 %722 }
 0x43e   : > { %v726_v28 = vmul.f32 1.442695, %v724_v26  ;;  %v725_v29 = vsub.f32 %v716_v14, %v723_v27 }
 0x440   : > { %2799 = vpow2.f32 %v726_v28  ;;  %v728_v31 = vmul.f32 1.442695, %v725_v29 }
 0x442   : > { %2801 = vpow2.f32 %v728_v31 }
 0x44a   : > { %v2800_v32 = vpop.eup %2799 }
 0x44b   : > { %v730_v33 = vsel %vm717_vm3, %v2800_v32, 0.0 }
 0x44c   : > { %v2802_v34 = vpop.eup %2801  ;;  %731 = vadd.xlane.f32.xlu0 %v730_v33 }
 0x44d   : > { %v733_v35 = vsel %vm717_vm3, %v2802_v34, 0.0 }
 0x44e   : > { %734 = vadd.xlane.f32.xlu1 %v733_v35 }
 0x4ae   : > { %v847_v36 = vpop.xlane.xlu0 %846 }
 0x4af   : > { %v851_v37 = vsub.f32 %v843_v18, %v847_v36 }
 0x4b0   : > { %v850_v38 = vpop.xlane.xlu1 %849 }
 0x4b1   : > { %v853_v39 = vmul.f32 1.442695, %v851_v37  ;;  %v852_v40 = vsub.f32 %v844_v22, %v850_v38 }
 0x4b3   : > { %2803 = vpow2.f32 %v853_v39  ;;  %v855_v41 = vmul.f32 1.442695, %v852_v40 }
 0x4b5   : > { %2805 = vpow2.f32 %v855_v41 }
 0x4bd   : > { %v2804_v42 = vpop.eup %2803 }
 0x4be   : > { %v857_v43 = vsel %vm717_vm3, %v2804_v42, 0.0 }
 0x4bf   : > { %v2806_v44 = vpop.eup %2805  ;;  %858 = vadd.xlane.f32.xlu0 %v857_v43 }
 0x4c0   : > { %v860_v45 = vsel %vm717_vm3, %v2806_v44, 0.0 }
 0x4c1   : > { %861 = vadd.xlane.f32.xlu1 %v860_v45 }
 0x4d2   : > { %1035 = vrot.lane.b32.xlu1 %v3437_v63, %s3105_s14 }
 0x4d5   : > { %869 = vrot.lane.b32.xlu0 %v3435_v60, %s3104_s8  ;;  %s3011_s8 = sshll.u32 %s3107_s30, 4  ;;  %s3012_s8 = int_to_ptr.vmem [resolvable:$false] %s3011_s8 }
 0x4d6   : > { %1033 = vrot.lane.b32.xlu1 %v3433_v59, %s3105_s14  ;;  %p3014_p4 = scmp.lt.s32.totalorder %s3600_s23, %s3012_s8 }
 0x4d9   : > { %v732_v46 = vpop.xlane.xlu0 %731 }
 0x4da   : > { %2807 = vrcp.f32 %v732_v46 }
 0x4db   : > { %v735_v47 = vpop.xlane.xlu1 %734 }
 0x4dc   : > { %2809 = vrcp.f32 %v735_v47 }
 0x4e4   : > { %v2808_v48 = vpop.eup %2807 }
 0x4e5   : > { %v737_v50 = vmul.f32 %v2808_v48, %v2800_v32 }
 0x4e6   : > { %v2810_v49 = vpop.eup %2809 }
 0x4e7   : > { %v739_v51 = vmul.f32 %v2810_v49, %v2802_v34 }
 0x4e9   : > { %v740_v52 = vpack.c.bf16 %v739_v51, %v737_v50 }
 0x4eb   : > { %2491 = vmatmul.mubr.msk.bf16.vlgmr.msra.gmra.mrb[4].mxu1 %vm717_vm3, %v740_v52 }
 0x4ec   : > { %2502 = vmatprep.mubr.msk.bf16.mxu1 %vm3103_vm0, %v3101_v4 }
 0x54c   : > { %v859_v55 = vpop.xlane.xlu0 %858 }
 0x54d   : > { %2811 = vrcp.f32 %v859_v55 }
 0x54e   : > { %v862_v56 = vpop.xlane.xlu1 %861 }
 0x54f   : > { %2813 = vrcp.f32 %v862_v56 }
 0x550   : > { %v870_v57 = vpop.permute.xlu0 %869 }
 0x551   : > { %2501 = vmatpush3.bf16.msra.mxu1 %v870_v57 }
 0x552   : > { %2514 = vmatprep.subr.bf16.mxu1 %v3101_v4  ;;  %v1036_v15 = vpop.permute.xlu1 %1035 }
 0x553   : > { %v1041_v19 = vsel %vm667_vm1, %v1036_v15, 0 }
 0x556   : > { %v1034_v20 = vpop.permute.xlu1 %1033 }
 0x557   : > { %v2812_v58 = vpop.eup %2811 }
 0x558   : > { %v864_v62 = vmul.f32 %v2812_v58, %v2804_v42 }
 0x559   : > { %v2814_v61 = vpop.eup %2813 }
 0x55a   : > { %v866_v0 = vmul.f32 %v2814_v61, %v2806_v44 }
 0x55c   : > { %v867_v2 = vpack.c.bf16 %v866_v0, %v864_v62  ;;  %v2712_v62 = vld [vmem:[#allocation8 + $0x28] sm:$0xff]  }
 0x55e   : > { %2503 = vmatmul.mubr.msk.bf16.vlgmr.msra.gmra.mrb[8].mxu1 %vm717_vm3, %v867_v2 }
 0x55f   : > { %2515 = vmatpush3.bf16.msra.mxu1 %v2707_v1  ;;  %2518 = vmatprep.mubr.msk.bf16.mxu1 %vm3103_vm0, %v3101_v4 }
 0x560   : > { %2516 = vmatprep.subr.bf16.mxu1 %v3101_v4 }
 0x563   : > { %2517 = vmatpush3.bf16.msra.mxu1 %v2708_v3 }
 0x564   : > { %2528 = vmatprep.subr.bf16.mxu1 %v3101_v4 }
 0x5be   : > { %v778_v5 = vpop.f32.mrb[4].mxu1 }
 0x5bf   : > { %v2492_v9 = vpop.f32.mrb[5].mxu1 }
 0x5c0   : > { %v781_v10 = vpop.f32.mrb[6].mxu1 }
 0x5c1   : > { %v785_v11 = vpack.c.bf16 %v781_v10, %v778_v5  ;;  %v2493_v12 = vpop.f32.mrb[7].mxu1 }
 0x5c3   : > { %2519 = vmatmul.mubr.msk.bf16.vlgmr.msra.gmra.mrb[12].mxu1 %vm667_vm1, %v785_v11 }
 0x5c4   : > { %2530 = vmatprep.mubr.msk.bf16.mxu1 %vm3103_vm0, %v3101_v4 }
 0x631   : > { %v909_v13 = vpop.f32.mrb[8].mxu1 }
 0x632   : > { %v2504_v14 = vpop.f32.mrb[9].mxu1 }
 0x633   : > { %v912_v16 = vpop.f32.mrb[10].mxu1 }
 0x634   : > { %v916_v17 = vpack.c.bf16 %v912_v16, %v909_v13  ;;  %v2505_v18 = vpop.f32.mrb[11].mxu1 }
 0x636   : > { %2511 = vmatmul.mubr.msk.bf16.vlgmr.msra.gmra.mrb[12].mxu0 %vm667_vm1, %v916_v17 }
 0x637   : > { %2523 = vmatpush3.bf16.xpose.msra.mxu0 %v1041_v19  ;;  %2524 = vmatprep.mubr.msk.bf16.mxu0 %vm3103_vm0, %v3101_v4 }
 0x638   : > { %2534 = vmatprep.subr.bf16.mxu0 %v3101_v4 }
 0x63e   : > { %2525 = vmatmul.mubr.msk.bf16.vlgmr.msra.gmra.mrb[16].mxu0 %vm667_vm1, %v1034_v20 }
 0x63f   : > { %2538 = vmatprep.mubr.msk.bf16.mxu0 %vm3103_vm0, %v3101_v4 }
 0x696   : > { %v1026_v21 = vpop.f32.mrb[12].mxu1 }
 0x697   : > { %v2520_v22 = vpop.f32.mrb[13].mxu1 }
 0x698   : > { %v1029_v23 = vpop.f32.mrb[14].mxu1 }
 0x699   : > { %v2521_v24 = vpop.f32.mrb[15].mxu1 }
 0x709   : > { %v970_v25 = vpop.f32.mrb[12].mxu0 }
 0x70a   : > { %v3516_v26 = vadd.f32 %v1026_v21, %v970_v25  ;;  %v2512_v27 = vpop.f32.mrb[13].mxu0 }
 0x70b   : > { %v973_v28 = vpop.f32.mrb[14].mxu0 }
 0x70c   : > { %v3518_v29 = vadd.f32 %v1029_v23, %v973_v28  ;;  %v2513_v31 = vpop.f32.mrb[15].mxu0 }
 0x711   : > { %v1077_v32 = vpop.f32.mrb[16].mxu0 }
 0x712   : > { %v1084_v33 = vsel %vm662_vm2, %v1077_v32, -1e+30  ;;  %v2526_v34 = vpop.f32.mrb[17].mxu0 }
 0x713   : > { %v1080_v35 = vpop.f32.mrb[18].mxu0  ;;  %v1086_v36 = vsel %vm717_vm3, %v1084_v33, -inf }
 0x714   : > { %v1085_v37 = vsel %vm663_vm4, %v1080_v35, -1e+30  ;;  %1087 = vmax.xlane.f32.xlu1 %v1086_v36  ;;  %v2527_v38 = vpop.f32.mrb[19].mxu0 }
 0x715   : > { %v1089_v39 = vsel %vm717_vm3, %v1085_v37, -inf }
 0x716   : > { %1090 = vmax.xlane.f32.xlu0 %v1089_v39 }
 0x725   : > { %1109 = vrot.lane.b32.xlu1 %v3435_v60, %s3105_s14  ;;  %s3013_s14 = scalar_lea.vmem %s3012_s8, 512 }
 0x729   : > { %1219 = vrot.lane.b32.xlu1 %v3433_v59, %s3106_s9  ;;  %v2711_v59 = vld [vmem:[#allocation8 + $0x20] sm:$0xff]  }
 0x72a   : > { %2535 = vmatpush3.bf16.msra.mxu0 %v2711_v59 }
 0x72b   : > { %2536 = vmatprep.subr.bf16.mxu0 %v3101_v4 }
 0x72e   : > { %2537 = vmatpush3.bf16.msra.mxu0 %v2712_v62  ;;  %v2726_v62 = vld [vmem:[#allocation10 + $0x2c] ss:$16 sps:$4 sm:$0xff]  }
 0x72f   : > { %2548 = vmatprep.subr.bf16.mxu0 %v3101_v4 }
 0x7a1   : > { %v1088_v40 = vpop.xlane.xlu1 %1087 }
 0x7a2   : > { %v1092_v41 = vsub.f32 %v1084_v33, %v1088_v40 }
 0x7a3   : > { %v1091_v42 = vpop.xlane.xlu0 %1090 }
 0x7a4   : > { %v1094_v43 = vmul.f32 1.442695, %v1092_v41  ;;  %v1093_v44 = vsub.f32 %v1085_v37, %v1091_v42 }
 0x7a5   : > { %v1110_v45 = vpop.permute.xlu1 %1109 }
 0x7a6   : > { %2815 = vpow2.f32 %v1094_v43  ;;  %v1096_v46 = vmul.f32 1.442695, %v1093_v44  ;;  %2529 = vmatpush3.bf16.msra.mxu1 %v1110_v45 }
 0x7a7   : > { %2542 = vmatprep.subr.bf16.mxu1 %v3101_v4 }
 0x7a8   : > { %2817 = vpow2.f32 %v1096_v46 }
 0x7b0   : > { %v2816_v47 = vpop.eup %2815 }
 0x7b1   : > { %v1098_v48 = vsel %vm717_vm3, %v2816_v47, 0.0 }
 0x7b2   : > { %v2818_v49 = vpop.eup %2817  ;;  %1099 = vadd.xlane.f32.xlu0 %v1098_v48 }
 0x7b3   : > { %v1101_v50 = vsel %vm717_vm3, %v2818_v49, 0.0 }
 0x7b6   : > { %1102 = vadd.xlane.f32.xlu0 %v1101_v50  ;;  %v2835_v50 = vld [vmem:[%s3386_s18] sm:$0xff] }
 0x7cc   : > { %1221 = vrot.lane.b32.xlu0 %v3437_v63, %s3106_s9  ;;  %v1220_v63 = vpop.permute.xlu1 %1219 }
 0x83f   : > { %v1100_v51 = vpop.xlane.xlu0 %1099 }
 0x840   : > { %2819 = vrcp.f32 %v1100_v51 }
 0x843   : > { %v1103_v52 = vpop.xlane.xlu0 %1102 }
 0x844   : > { %2821 = vrcp.f32 %v1103_v52 }
 0x847   : > { %v1222_v57 = vpop.permute.xlu0 %1221 }
 0x848   : > { %v1227_v61 = vsel %vm667_vm1, %v1222_v57, 0  ;;  %v2717_v57 = vld [vmem:[#allocation10 + $0x4] ss:$16 sps:$4 sm:$0xff]  }
 0x84a   : > { %v2820_v53 = vpop.eup %2819 }
 0x84b   : > { %v1105_v55 = vmul.f32 %v2820_v53, %v2816_v47  ;;  %v2836_v53 = vld [vmem:[%s3386_s18 + $0x8] sm:$0xff]  ;;  %s3007_s18 = scalar_lea.vmem %s3600_s23, 256 }
 0x84c   : > { %p3008_p11 = scmp.ne.s32.totalorder %s3600_s23, %s3007_s18  ;;  %p3015_p1 = scmp.lt.s32.totalorder %s3013_s14, %s3007_s18 }
 0x84e   : > { %v2822_v54 = vpop.eup %2821  ;;  %p3009_p5 = pnand %p3008_p11, %p3678_p13  ;;  %p3016_p3 = por %p3015_p1, %p3014_p4 }
 0x84f   : > { %v1107_v56 = vmul.f32 %v2822_v54, %v2818_v49  ;;  %v2306_v49 = vld [vmem:[#allocation5 + $0x2] ss:$0 sm:$0xff] }
 0x850   : > { %p3010_p7 = pneg %p3009_p5 }
 0x851   : > { %v1108_v58 = vpack.c.bf16 %v1107_v56, %v1105_v55 }
 0x852   : > { %p3017_p8 = pnand %p3016_p3, %p3010_p7 }
 0x853   : > { %2531 = vmatmul.mubr.msk.bf16.vlgmr.msra.gmra.mrb[16].mxu1 %vm717_vm3, %v1108_v58  ;;  %v2718_v58 = vld [vmem:[#allocation10 + $0x8] ss:$16 sps:$4 sm:$0xff]  }
 0x854   : > { %2543 = vmatpush3.bf16.xpose.msra.mxu1 %v1227_v61  ;;  %2544 = vmatprep.mubr.msk.bf16.mxu1 %vm3103_vm0, %v3101_v4  ;;  %v2720_v61 = vld [vmem:[#allocation10 + $0xc] ss:$16 sps:$4 sm:$0xff]  }
 0x855   : > { %2554 = vmatprep.subr.bf16.mxu1 %v3101_v4 }
 0x85b   : > { %2545 = vmatmul.mubr.msk.bf16.vlgmr.msra.gmra.mrb[20].mxu1 %vm667_vm1, %v1220_v63  ;;  %v2723_v63 = vld [vmem:[#allocation10 + $0x24] ss:$16 sps:$4 sm:$0xff]  }
 0x85c   : > { %2558 = vmatprep.mubr.msk.bf16.mxu1 %vm3103_vm0, %v3101_v4  ;;  %2555 = vmatpush3.bf16.msra.mxu1 %v2713_v8  ;;  %v2750_v8 = vld [vmem:[#allocation10 + $0xac] ss:$16 sps:$4 sm:$0xff]  }
 0x85d   : > { %2556 = vmatprep.subr.bf16.mxu1 %v3101_v4 }
 0x926   : > { %v1149_v0 = vpop.f32.mrb[16].mxu1 }
 0x927   : > { %v2532_v1 = vpop.f32.mrb[17].mxu1 }
 0x928   : > { %v1152_v2 = vpop.f32.mrb[18].mxu1  ;;  %v2724_v1 = vld [vmem:[#allocation10 + $0x28] ss:$16 sps:$4 sm:$0xff]  }
 0x929   : > { %v1156_v3 = vpack.c.bf16 %v1152_v2, %v1149_v0  ;;  %v2533_v5 = vpop.f32.mrb[19].mxu1  ;;  %v2721_v0 = vld [vmem:[#allocation10 + $0x20] ss:$16 sps:$4 sm:$0xff]  }
 0x92b   : > { %2539 = vmatmul.mubr.msk.bf16.vlgmr.msra.gmra.mrb[20].mxu0 %vm667_vm1, %v1156_v3 }
 0x92c   : > { %2550 = vmatprep.mubr.msk.bf16.mxu0 %vm3103_vm0, %v3101_v4  ;;  %v2714_v4 = vld [vmem:[#allocation8 + $0x38] sm:$0xff]  }
 0x92d   : > { %2557 = vmatpush3.bf16.msra.mxu1 %v2714_v4 }
 0x92e   : > { %v1263_v9 = vpop.f32.mrb[20].mxu1  ;;  %1705 = vmatprep.subr.bf16.mxu1 %v2720_v61  ;;  %v2770_v61 = vld [vmem:[#allocation11 + $0x88] sm:$0xff]  }
 0x92f   : > { %v1270_v10 = vsel %vm662_vm2, %v1263_v9, -1e+30  ;;  %v2546_v11 = vpop.f32.mrb[21].mxu1 }
 0x930   : > { %v1266_v12 = vpop.f32.mrb[22].mxu1  ;;  %v1272_v13 = vsel %vm717_vm3, %v1270_v10, -inf }
 0x931   : > { %v1271_v14 = vsel %vm663_vm4, %v1266_v12, -1e+30  ;;  %1273 = vmax.xlane.f32.xlu1 %v1272_v13  ;;  %v2547_v15 = vpop.f32.mrb[23].mxu1 }
 0x932   : > { %v1275_v16 = vsel %vm717_vm3, %v1271_v14, -inf  ;;  %v2732_v15 = vld [vmem:[#allocation10 + $0x4c] ss:$16 sps:$4 sm:$0xff]  }
 0x933   : > { %1276 = vmax.xlane.f32.xlu0 %v1275_v16  ;;  %v2727_v16 = vld [vmem:[#allocation10 + $0x40] ss:$16 sps:$4 sm:$0xff]  }
 0x9be   : > { %v1274_v17 = vpop.xlane.xlu1 %1273 }
 0x9bf   : > { %v1278_v18 = vsub.f32 %v1270_v10, %v1274_v17  ;;  %v2730_v17 = vld [vmem:[#allocation10 + $0x48] ss:$16 sps:$4 sm:$0xff]  }
 0x9c0   : > { %v1277_v19 = vpop.xlane.xlu0 %1276 }
 0x9c1   : > { %v1280_v20 = vmul.f32 1.442695, %v1278_v18  ;;  %v1279_v21 = vsub.f32 %v1271_v14, %v1277_v19  ;;  %v2729_v14 = vld [vmem:[#allocation10 + $0x44] ss:$16 sps:$4 sm:$0xff]   ;;  %v2738_v19 = vld [vmem:[#allocation10 + $0x6c] ss:$16 sps:$4 sm:$0xff]  }
 0x9c2   : > { %v2735_v18 = vld [vmem:[#allocation10 + $0x64] ss:$16 sps:$4 sm:$0xff]  }
 0x9c3   : > { %2823 = vpow2.f32 %v1280_v20  ;;  %v1282_v22 = vmul.f32 1.442695, %v1279_v21  ;;  %v2733_v20 = vld [vmem:[#allocation10 + $0x60] ss:$16 sps:$4 sm:$0xff]   ;;  %v2736_v21 = vld [vmem:[#allocation10 + $0x68] ss:$16 sps:$4 sm:$0xff]  }
 0x9c5   : > { %2825 = vpow2.f32 %v1282_v22  ;;  %v2741_v22 = vld [vmem:[#allocation10 + $0x84] ss:$16 sps:$4 sm:$0xff]  }
 0x9cd   : > { %v2824_v23 = vpop.eup %2823 }
 0x9ce   : > { %v1284_v24 = vsel %vm717_vm3, %v2824_v23, 0.0 }
 0x9cf   : > { %v2826_v25 = vpop.eup %2825  ;;  %1285 = vadd.xlane.f32.xlu0 %v1284_v24  ;;  %v2739_v24 = vld [vmem:[#allocation10 + $0x80] ss:$16 sps:$4 sm:$0xff]  }
 0x9d0   : > { %v1287_v7 = vsel %vm717_vm3, %v2826_v25, 0.0 }
 0x9d1   : > { %1288 = vadd.xlane.f32.xlu1 %v1287_v7  ;;  %v2747_v7 = vld [vmem:[#allocation10 + $0xa4] ss:$16 sps:$4 sm:$0xff]  }
 0x9e5   : > { %1295 = vrot.lane.b32.xlu0 %v3435_v60, %s3106_s9 }
 0x9fe   : > { %v1210_v27 = vpop.f32.mrb[20].mxu0 }
 0x9ff   : > { %v1217_v28 = vadd.f32 %v1210_v27, %v3516_v26  ;;  %v2540_v31 = vpop.f32.mrb[21].mxu0  ;;  %v2745_v27 = vld [vmem:[#allocation10 + $0xa0] ss:$16 sps:$4 sm:$0xff]  }
 0xa00   : > { %v1213_v32 = vpop.f32.mrb[22].mxu0  ;;  %v2753_v31 = vld [vmem:[#allocation10 + $0xc4] ss:$16 sps:$4 sm:$0xff]  }
 0xa01   : > { %v1218_v33 = vadd.f32 %v1213_v32, %v3518_v29  ;;  %v2541_v34 = vpop.f32.mrb[23].mxu0  ;;  %v2756_v32 = vld [vmem:[#allocation10 + $0xcc] ss:$16 sps:$4 sm:$0xff]  }
 0xa02   : > { %v2754_v34 = vld [vmem:[#allocation10 + $0xc8] ss:$16 sps:$4 sm:$0xff]  }
 0xa5c   : > { %v1286_v35 = vpop.xlane.xlu0 %1285 }
 0xa5d   : > { %2827 = vrcp.f32 %v1286_v35  ;;  %v2759_v35 = vld [vmem:[#allocation10 + $0xe4] ss:$16 sps:$4 sm:$0xff]  }
 0xa5e   : > { %v1289_v36 = vpop.xlane.xlu1 %1288 }
 0xa5f   : > { %2829 = vrcp.f32 %v1289_v36  ;;  %v2762_v36 = vld [vmem:[#allocation10 + $0xec] ss:$16 sps:$4 sm:$0xff]  }
 0xa60   : > { %v1296_v37 = vpop.permute.xlu0 %1295 }
 0xa61   : > { %2549 = vmatpush3.bf16.msra.mxu0 %v1296_v37  ;;  %v2757_v37 = vld [vmem:[#allocation10 + $0xe0] ss:$16 sps:$4 sm:$0xff]  }
 0xa62   : > { %1662 = vmatprep.subr.bf16.mxu0 %v2717_v57  ;;  %v2768_v57 = vld [vmem:[#allocation11 + $0xc8] sm:$0xff]  }
 0xa67   : > { %v2828_v38 = vpop.eup %2827 }
 0xa68   : > { %v1291_v39 = vmul.f32 %v2828_v38, %v2824_v23  ;;  %v2744_v23 = vld [vmem:[#allocation10 + $0x8c] ss:$16 sps:$4 sm:$0xff]   ;;  %v2760_v38 = vld [vmem:[#allocation10 + $0xe8] ss:$16 sps:$4 sm:$0xff]  }
 0xa69   : > { %v2830_v60 = vpop.eup %2829 }
 0xa6a   : > { %v1293_v40 = vmul.f32 %v2830_v60, %v2826_v25  ;;  %v2742_v25 = vld [vmem:[#allocation10 + $0x88] ss:$16 sps:$4 sm:$0xff]   ;;  %v2763_v60 = vld [vmem:[#allocation11 + $0x40] sm:$0xff]  }
 0xa6c   : > { %v1294_v41 = vpack.c.bf16 %v1293_v40, %v1291_v39  ;;  %v2764_v39 = vld [vmem:[#allocation11 + $0xc0] sm:$0xff]  }
 0xa6e   : > { %2551 = vmatmul.mubr.msk.bf16.vlgmr.msra.gmra.mrb[24].mxu0 %vm717_vm3, %v1294_v41 }
 0xa6f   : > { %1694 = vmatprep.mubr.bf16.mxu0 %v3102_v30 }
 0xb41   : > { %v1335_v26 = vpop.f32.mrb[24].mxu0 }
 0xb42   : > { %v2552_v29 = vpop.f32.mrb[25].mxu0 }
 0xb43   : > { %v1338_v42 = vpop.f32.mrb[26].mxu0 }
 0xb44   : > { %v1342_v43 = vpack.c.bf16 %v1338_v42, %v1335_v26  ;;  %v2553_v44 = vpop.f32.mrb[27].mxu0 }
 0xb46   : > { %2559 = vmatmul.mubr.msk.bf16.vlgmr.msra.gmra.mrb[24].mxu1 %vm667_vm1, %v1342_v43 }
 0xb47   : > { %1737 = vmatprep.mubr.bf16.mxu1 %v3102_v30  ;;  %v2715_v30 = vld [vmem:[#allocation10] ss:$16 sps:$4 sm:$0xff]   ;;  %1706 = vmatpush1.bf16.msra.mxu1 %v2718_v58  ;;  %v2769_v58 = vld [vmem:[#allocation11 + $0x8] sm:$0xff]  }
 0xb48   : > { %1663 = vmatpush1.bf16.msra.mxu0 %v2715_v30  ;;  %1707 = vmatprep.subr.bf16.mxu1 %v2726_v62  ;;  %v2767_v30 = vld [vmem:[#allocation11 + $0x48] sm:$0xff]   ;;  %v2772_v62 = vld [vmem:[#allocation11 + $0xd0] sm:$0xff]  }
 0xb49   : > { %1664 = vmatprep.subr.bf16.mxu0 %v2723_v63  ;;  %v2771_v63 = vld [vmem:[#allocation11 + $0x50] sm:$0xff]  }
 0xb4b   : > { %1708 = vmatpush1.bf16.msra.mxu1 %v2724_v1  ;;  %v2774_v1 = vld [vmem:[#allocation11 + $0x90] sm:$0xff]  }
 0xb4c   : > { %1665 = vmatpush1.bf16.msra.mxu0 %v2721_v0  ;;  %1709 = vmatprep.subr.bf16.mxu1 %v2732_v15  ;;  %v2773_v0 = vld [vmem:[#allocation11 + $0x10] sm:$0xff]   ;;  %v2784_v15 = vld [vmem:[#allocation11 + $0xe8] sm:$0xff]  }
 0xb4d   : > { %1666 = vmatprep.subr.bf16.mxu0 %v2729_v14  ;;  %v2783_v14 = vld [vmem:[#allocation11 + $0x68] sm:$0xff]  }
 0xb4f   : > { %1710 = vmatpush1.bf16.msra.mxu1 %v2730_v17  ;;  %v2786_v17 = vld [vmem:[#allocation11 + $0xa8] sm:$0xff]  }
 0xb50   : > { %1667 = vmatpush1.bf16.msra.mxu0 %v2727_v16  ;;  %1711 = vmatprep.subr.bf16.mxu1 %v2738_v19  ;;  %v2785_v16 = vld [vmem:[#allocation11 + $0x28] sm:$0xff]   ;;  %v2788_v19 = vld [vmem:[#allocation11 + $0xf0] sm:$0xff]  }
 0xb51   : > { %1668 = vmatprep.subr.bf16.mxu0 %v2735_v18  ;;  %v2787_v18 = vld [vmem:[#allocation11 + $0x70] sm:$0xff]  }
 0xb53   : > { %1712 = vmatpush1.bf16.msra.mxu1 %v2736_v21  ;;  %v2790_v21 = vld [vmem:[#allocation11 + $0xb0] sm:$0xff]  }
 0xb54   : > { %1669 = vmatpush1.bf16.msra.mxu0 %v2733_v20  ;;  %1713 = vmatprep.subr.bf16.mxu1 %v2744_v23  ;;  %v2789_v20 = vld [vmem:[#allocation11 + $0x30] sm:$0xff]   ;;  %v2792_v23 = vld [vmem:[#allocation11 + $0xf8] sm:$0xff]  }
 0xb55   : > { %1670 = vmatprep.subr.bf16.mxu0 %v2741_v22  ;;  %v2791_v22 = vld [vmem:[#allocation11 + $0x78] sm:$0xff]  }
 0xb57   : > { %1714 = vmatpush1.bf16.msra.mxu1 %v2742_v25  ;;  %v2794_v25 = vld [vmem:[#allocation11 + $0xb8] sm:$0xff]  }
 0xb58   : > { %1671 = vmatpush1.bf16.msra.mxu0 %v2739_v24  ;;  %1715 = vmatprep.subr.bf16.mxu1 %v2750_v8  ;;  %v2793_v24 = vld [vmem:[#allocation11 + $0x38] sm:$0xff]   ;;  %v1492_v8 = vsub.s32 2, %v3457_v6 }
 0xb59   : > { %1672 = vmatprep.subr.bf16.mxu0 %v2747_v7  ;;  %v1484_v7 = vsub.s32 0, %v3457_v6 }
 0xb5c   : > { %1673 = vmatpush1.bf16.msra.mxu0 %v2745_v27  ;;  %v1480_v27 = vld [vmem:[%s3655_s5] sm:$0xf] }
 0xb5d   : > { %1674 = vmatprep.subr.bf16.mxu0 %v2753_v31  ;;  %v1496_v31 = vsub.s32 3, %v3457_v6 }
 0xc19   : > { %v1396_v45 = vpop.f32.mrb[24].mxu1 }
 0xc1a   : > { %v1403_v46 = vadd.f32 %v1396_v45, %v1217_v28  ;;  %v2560_v47 = vpop.f32.mrb[25].mxu1  ;;  %v2748_v28 = vld [vmem:[#allocation10 + $0xa8] ss:$16 sps:$4 sm:$0xff]  }
 0xc1b   : > { %v1399_v48 = vpop.f32.mrb[26].mxu1  ;;  %1716 = vmatpush1.bf16.msra.mxu1 %v2748_v28  ;;  %v2307_v45 = vld [vmem:[#allocation5 + $0x3] ss:$0 sm:$0xff]  ;;  %v1488_v28 = vsub.s32 1, %v3457_v6 }
 0xc1c   : > { %v1405_v59 = vadd.f32 %v2835_v50, %v1403_v46  ;;  %v1404_v51 = vadd.f32 %v1399_v48, %v1218_v33  ;;  %v2561_v52 = vpop.f32.mrb[27].mxu1  ;;  %v2751_v33 = vld [vmem:[#allocation10 + $0xc0] ss:$16 sps:$4 sm:$0xff]   ;;  %1717 = vmatprep.subr.bf16.mxu1 %v2756_v32  ;;  %v1485_v32 = vrot.slane %v1480_v27, %v1484_v7 }
 0xc1d   : > { %1675 = vmatpush1.bf16.msra.mxu0 %v2751_v33  ;;  %v2765_v52 = vld [vmem:[#allocation11] sm:$0xff]   ;;  %v1493_v33 = vrot.slane %v1480_v27, %v1492_v8 }
 0xc1e   : > { %v1406_v54 = vadd.f32 %v2836_v53, %v1404_v51  ;;  %v3571_v55 = vadd.f32 %v2306_v49, %v1405_v59  ;;  %1676 = vmatprep.subr.bf16.mxu0 %v2759_v35  ;;  %v2766_v53 = vld [vmem:[#allocation11 + $0x80] sm:$0xff]   ;;  %v1497_v35 = vrot.slane %v1480_v27, %v1496_v31 }
 0xc1f   : > { %1718 = vmatpush1.bf16.msra.mxu1 %v2754_v34  ;;  %v1489_v34 = vrot.slane %v1480_v27, %v1488_v28 }
 0xc20   : > { %1413 = vadd.xlane.f32.xlu1 %v3571_v55  ;;  %v3574_v56 = vadd.f32 %v2306_v49, %v1406_v54  ;;  %1719 = vmatprep.subr.bf16.mxu1 %v2762_v36  ;;  %v2308_v49 = vld [vmem:[#allocation5 + $0x4] ss:$0 sm:$0xff] }
 0xc21   : > { %1677 = vmatpush1.bf16.msra.mxu0 %v2757_v37 }
 0xc22   : > { %2418 = vmatprep.subr.bf16.mxu0 %v2763_v60 }
 0xc23   : > { %1720 = vmatpush1.bf16.msra.mxu1 %v2760_v38 }
 0xc24   : > { %1415 = vadd.xlane.f32.xlu1 %v3574_v56  ;;  %2440 = vmatprep.subr.bf16.mxu1 %v2764_v39 }
 0xcad   : > { %v1414_v2 = vpop.xlane.xlu1 %1413 }
 0xcae   : > { %v1417_v3 = vmul.f32 0.0078125, %v1414_v2  ;;  %v2775_v2 = vld [vmem:[#allocation11 + $0x58] sm:$0xff]  }
 0xcb0   : > { %v3578_v5 = vsub.f32 %v3571_v55, %v1417_v3  ;;  %v2776_v3 = vld [vmem:[#allocation11 + $0xd8] sm:$0xff]  }
 0xcb1   : > { %v1416_v9 = vpop.xlane.xlu1 %1415 }
 0xcb2   : > { %v1418_v10 = vmul.f32 0.0078125, %v1416_v9  ;;  %v1421_v11 = vmul.f32 %v3578_v5, %v3578_v5  ;;  %v2778_v9 = vld [vmem:[#allocation11 + $0x98] sm:$0xff]  }
 0xcb4   : > { %v3583_v12 = vsub.f32 %v3574_v56, %v1418_v10  ;;  %1423 = vadd.xlane.f32.xlu1 %v1421_v11  ;;  %v2779_v10 = vld [vmem:[#allocation11 + $0x60] sm:$0xff]  }
 0xcb5   : > { %v2780_v11 = vld [vmem:[#allocation11 + $0xe0] sm:$0xff]  }
 0xcb6   : > { %v1422_v13 = vmul.f32 %v3583_v12, %v3583_v12 }
 0xcb8   : > { %1425 = vadd.xlane.f32.xlu1 %v1422_v13  ;;  %v2782_v13 = vld [vmem:[#allocation11 + $0xa0] sm:$0xff]  }
 0xd41   : > { %v1424_v40 = vpop.xlane.xlu1 %1423 }
 0xd42   : > { %v1427_v41 = vmul.f32 0.0078125, %v1424_v40 }
 0xd44   : > { %v1429_v4 = vadd.f32 1e-05, %v1427_v41 }
 0xd45   : > { %v1426_v26 = vpop.xlane.xlu1 %1425 }
 0xd46   : > { %2831 = vrsqrt.f32 %v1429_v4  ;;  %v1428_v29 = vmul.f32 0.0078125, %v1426_v26 }
 0xd48   : > { %v1430_v42 = vadd.f32 1e-05, %v1428_v29 }
 0xd4a   : > { %2833 = vrsqrt.f32 %v1430_v42 }
 0xd50   : > { %v2832_v43 = vpop.eup %2831 }
 0xd51   : > { %v1433_v44 = vmul.f32 %v2832_v43, %v3578_v5  ;;  %v2777_v5 = vld [vmem:[#allocation11 + $0x18] sm:$0xff]  }
 0xd53   : > { %v1439_v48 = vmul.f32 %v2307_v45, %v1433_v44 }
 0xd54   : > { %v2834_v46 = vpop.eup %2833 }
 0xd55   : > { %v1434_v47 = vmul.f32 %v2834_v46, %v3583_v12  ;;  %v1445_v59 = vadd.f32 %v2308_v49, %v1439_v48  ;;  %v2781_v12 = vld [vmem:[#allocation11 + $0x20] sm:$0xff]  }
 0xd57   : > { %v1440_v50 = vmul.f32 %v2307_v45, %v1434_v47 }
 0xd59   : > { %v1446_v51 = vadd.f32 %v2308_v49, %v1440_v50 }
 0xd5b   : > { %v1447_v54 = vpack.c.bf16 %v1446_v51, %v1445_v59 }
 0xd5d   : > { %1695 = vmatmul.mubr.bf16.vlgmr.msra.gmra.mrb[28].mxu0 %v1447_v54  ;;  %1738 = vmatmul.mubr.bf16.vlgmr.msra.gmra.mrb[28].mxu1 %v1447_v54 }
 0xd5e   : > { %2419 = vmatpush3.bf16.msra.mxu0 %v2765_v52  ;;  %2441 = vmatpush3.bf16.msra.mxu1 %v2766_v53 }
 0xd5f   : > { %2420 = vmatprep.subr.bf16.mxu0 %v2767_v30  ;;  %2442 = vmatprep.subr.bf16.mxu1 %v2768_v57 }
 0xd62   : > { %2421 = vmatpush3.bf16.msra.mxu0 %v2769_v58  ;;  %2443 = vmatpush3.bf16.msra.mxu1 %v2770_v61 }
 0xd63   : > { %2422 = vmatprep.subr.bf16.mxu0 %v2771_v63  ;;  %2444 = vmatprep.subr.bf16.mxu1 %v2772_v62  ;;  %v2341_v62 = vld [vmem:[#allocation5 + $0x5] ss:$0 sm:$0xff] }
 0xd66   : > { %2423 = vmatpush3.bf16.msra.mxu0 %v2773_v0  ;;  %2445 = vmatpush3.bf16.msra.mxu1 %v2774_v1 }
 0xd67   : > { %2424 = vmatprep.subr.bf16.mxu0 %v2775_v2  ;;  %2446 = vmatprep.subr.bf16.mxu1 %v2776_v3 }
 0xd6a   : > { %2425 = vmatpush3.bf16.msra.mxu0 %v2777_v5  ;;  %2447 = vmatpush3.bf16.msra.mxu1 %v2778_v9 }
 0xd6b   : > { %2426 = vmatprep.subr.bf16.mxu0 %v2779_v10  ;;  %2448 = vmatprep.subr.bf16.mxu1 %v2780_v11 }
 0xd6e   : > { %2427 = vmatpush3.bf16.msra.mxu0 %v2781_v12  ;;  %2449 = vmatpush3.bf16.msra.mxu1 %v2782_v13 }
 0xd6f   : > { %2428 = vmatprep.subr.bf16.mxu0 %v2783_v14  ;;  %2450 = vmatprep.subr.bf16.mxu1 %v2784_v15 }
 0xd72   : > { %2429 = vmatpush3.bf16.msra.mxu0 %v2785_v16  ;;  %2451 = vmatpush3.bf16.msra.mxu1 %v2786_v17 }
 0xd73   : > { %2430 = vmatprep.subr.bf16.mxu0 %v2787_v18  ;;  %2452 = vmatprep.subr.bf16.mxu1 %v2788_v19 }
 0xd76   : > { %2431 = vmatpush3.bf16.msra.mxu0 %v2789_v20  ;;  %2453 = vmatpush3.bf16.msra.mxu1 %v2790_v21 }
 0xd77   : > { %2432 = vmatprep.subr.bf16.mxu0 %v2791_v22  ;;  %2454 = vmatprep.subr.bf16.mxu1 %v2792_v23 }
 0xd7a   : > { %2433 = vmatpush3.bf16.msra.mxu0 %v2793_v24  ;;  %2455 = vmatpush3.bf16.msra.mxu1 %v2794_v25 }
 0xe30   : > { %v1696_v36 = vpop.f32.mrb[28].mxu0  ;;  %v1739_v37 = vpop.f32.mrb[28].mxu1 }
 0xe31   : > { %v1697_v38 = vadd.f32 %v1696_v36, %v1485_v32  ;;  %v1740_v60 = vadd.f32 %v1739_v37, %v1493_v33  ;;  %v1698_v39 = vpop.f32.mrb[29].mxu0  ;;  %v1741_v40 = vpop.f32.mrb[29].mxu1 }
 0xe32   : > { %v1699_v41 = vadd.f32 %v1698_v39, %v1489_v34  ;;  %v1742_v4 = vadd.f32 %v1741_v40, %v1497_v35  ;;  %v1700_v26 = vpop.f32.mrb[30].mxu0  ;;  %v1743_v29 = vpop.f32.mrb[30].mxu1 }
 0xe33   : > { %v1701_v42 = vadd.f32 %v1700_v26, %v1485_v32  ;;  %v1744_v43 = vadd.f32 %v1743_v29, %v1493_v33  ;;  %v1702_v44 = vpop.f32.mrb[31].mxu0  ;;  %v1745_v45 = vpop.f32.mrb[31].mxu1  ;;  %v1748_v47 = vmax.f32 %v1697_v38, 0.0  ;;  %v1750_v48 = vmax.f32 %v1740_v60, 0.0 }
 0xe34   : > { %v1703_v46 = vadd.f32 %v1702_v44, %v1489_v34  ;;  %v1746_v6 = vadd.f32 %v1745_v45, %v1497_v35  ;;  %v1749_v59 = vmax.f32 %v1699_v41, 0.0  ;;  %v1751_v51 = vmax.f32 %v1742_v4, 0.0 }
 0xe35   : > { %v1752_v49 = vmax.f32 %v1701_v42, 0.0  ;;  %v1754_v50 = vmax.f32 %v1744_v43, 0.0 }
 0xe36   : > { %v1753_v52 = vmax.f32 %v1703_v46, 0.0  ;;  %v1755_v53 = vmax.f32 %v1746_v6, 0.0 }
 0xe37   : > { %v1756_v54 = vpack.c.bf16 %v1752_v49, %v1748_v47  ;;  %v1758_v30 = vpack.c.bf16 %v1754_v50, %v1750_v48 }
 0xe38   : > { %v1757_v57 = vpack.c.bf16 %v1753_v52, %v1749_v59  ;;  %v1759_v58 = vpack.c.bf16 %v1755_v53, %v1751_v51 }
 0xe3a   : > { %2052 = vmatprep.mubr.bf16.mxu0 %v1757_v57  ;;  %2093 = vmatprep.mubr.bf16.mxu1 %v1759_v58 }
 0xe3b   : > { %2053 = vmatmul.mubr.bf16.vlgmr.msra.gmra.mrb[32].mxu0 %v1756_v54  ;;  %2094 = vmatmul.mubr.bf16.vlgmr.msra.gmra.mrb[32].mxu1 %v1758_v30 }
 0xf0e   : > { %v2434_v61 = vpop.f32.mrb[32].mxu0  ;;  %v2456_v63 = vpop.f32.mrb[32].mxu1 }
 0xf0f   : > { %v2435_v0 = vpop.f32.mrb[33].mxu0  ;;  %v2457_v1 = vpop.f32.mrb[33].mxu1 }
 0xf10   : > { %v2436_v2 = vadd.f32 %v2435_v0, %v2434_v61  ;;  %v2458_v3 = vadd.f32 %v2457_v1, %v2456_v63  ;;  %v2437_v5 = vpop.f32.mrb[34].mxu0  ;;  %v2459_v9 = vpop.f32.mrb[34].mxu1 }
 0xf11   : > { %v2438_v10 = vpop.f32.mrb[35].mxu0  ;;  %v2460_v11 = vpop.f32.mrb[35].mxu1 }
 0xf12   : > { %v2055_v12 = vadd.f32 %v2436_v2, %v2341_v62  ;;  %v2439_v13 = vadd.f32 %v2438_v10, %v2437_v5  ;;  %v2461_v14 = vadd.f32 %v2460_v11, %v2459_v9 }
 0xf14   : > { %v2096_v15 = vadd.f32 %v2458_v3, %v2055_v12  ;;  %v2058_v16 = vadd.f32 %v2439_v13, %v2341_v62 }
 0xf16   : > { %v2102_v17 = vadd.f32 %v2096_v15, %v3571_v55  ;;  %v2099_v18 = vadd.f32 %v2461_v14, %v2058_v16 }
 0xf18   : > { %2104 = vst [vmem:[%s367_s11] sm:$0xff] %v2102_v17  ;;  %v2103_v19 = vadd.f32 %v2099_v18, %v3574_v56 }
 0xf1a   : > { %2105 = vst [vmem:[%s367_s11 + $0x8] sm:$0xff] %v2103_v19 }
 0xf1b   : > { %3020 = shalt.err (!%p3017_p8)
}
 0xf1c   : > { %s3021_s9 = scalar_lea.hbm %s3605_s28, 256  ;;  %s3025_s11 = scalar_lea.hbm %s3657_s7, 512 }
 0xf1d   : > { %p3022_p6 = scmp.ne.s32.totalorder %s3605_s28, %s3021_s9  ;;  %p3026_p9 = scmp.lt.u32.totalorder %s3605_s28, %s3657_s7 }
 0xf1e   : > { %p3027_p10 = scmp.lt.u32.totalorder %s3025_s11, %s3021_s9  ;;  %p3029_p11 = scmp.lt.u32.totalorder %s3021_s9, %s3605_s28 }
 0xf1f   : > { %p3023_p0 = pnand %p3022_p6, %p3678_p13 }
 0xf20   : > { %p3028_p12 = por %p3027_p10, %p3026_p9 }
 0xf21   : > { %p3024_p2 = pneg %p3023_p0 }
 0xf22   : > { %p3030_p5 = por %p3029_p11, %p3028_p12 }
 0xf24   : > { %p3031_p7 = pnand %p3030_p5, %p3024_p2 }
 0xf26   : > { %3034 = shalt.err (!%p3031_p7)
}
 0xf27   : > { %s3108_s17 = smov 128   ;;  %s3109_s18 = smov 8  }
 0xf28   : > { %2584 = dma.vmem_to_hbm [thread:$0]  (%p3678_p13), %s3600_s23, 256, %s3605_s28, %s2107_s13, %s3108_s17, %s3108_s17, %s3109_s18  }
 0xf29 PF: > { %s2135_s30 = sand.u32 1, %s3073_s24   ;;  %p3679_p4 = scmp.ne.s32.totalorder %s3669_s15, 0 }
 0xf2a   : > { %p3680_p1 = scmp.ge.s32.totalorder %s3085_s27, 2  ;;  %s2136_s8 = scalar_lea.sflag [#allocation4], %s2135_s30 }
 0xf2c   : > { %p2607_p3 = pnand %p3680_p1, %p3679_p4 }
 0xf2e   : > { %3068 = dma.done.wait (!%p2607_p3), %s2136_s8, 256  }
 0xf2f   : > { %3070 = vsyncadd (!%p2607_p3), %s2136_s8, 4294967040  ;;  %p23_p8 = scmp.ge.s32.totalorder %s3307_s19, 4   ;;  %s3681_s24 = smov %s3077_s25 }
 0xf30   : > { %s3682_s25 = smov %s3081_s26  ;;  %s3683_s26 = smov %s3319_s12 }
 0xf31   : > { %s3684_s27 = smov %s3307_s19  ;;  %25 = sbr.rel (!%p23_p8) target bundleno = 8 (0x8), region = 113 }
 0xf38   :  { %2141 = vsyncpa [#allocation3], 1 }
 0xf39   :  { %2143 = vsyncpa [#allocation3 + $0x1], 1 }
 0xf3a   :  { %2144 = vsyncpa [#allocation6], 1 }
 0xf3b   :  { %2145 = vsyncpa [#allocation9], 1 }
 0xf3c   :  { %2146 = vsyncpa [#allocation12], 1 }
 0xf3d   :  { %2147 = vsyncpa [#allocation4], 1 }
 0xf3e   :  { %2149 = vsyncpa [#allocation4 + $0x1], 1 }

</bundles_post_ra>
